<compile_context>
chip_gen: v7x
topology: tpu7x:2x2x1
jax: 0.10.0
libtpu: 0.0.40
codegen_flags: <defaults>
</compile_context>

<pallas_src>
import jax
import jax.numpy as jnp
from jax import lax
from jax.experimental import pallas as pl
from jax.experimental.pallas import tpu as pltpu


def _ngcf_kernel(a_ref, ego0_ref, wgc_ref, wbi_ref, b_ref, out_ref, ego_sc):
    """One (pass p, row-tile i) step.

    pass p == 0      : copy pass — write ego0 (f32) to slab cols [0, D) and
                       stage it (bf16) into the carry.
    pass p >= 1      : NGCF propagation layer L = p - 1.

    a_ref    : (TM, N)   bf16  row strip of the normalized adjacency
    ego0_ref : (TM, D)   f32   row tile of the initial embeddings
    wgc_ref  : (K, D, D) bf16  W_gc for all layers (resident)
    wbi_ref  : (K, D, D) bf16  W_bi for all layers (resident)
    b_ref    : (K, 1, D) f32   b_gc + b_bi for all layers (resident)
    out_ref  : (TM, D)   f32   slab block: pass p -> columns [p*D, (p+1)*D)
    ego_sc   : (2, N, D) bf16  ping-pong carry of un-normalized ego embeddings
    """
    p = pl.program_id(0)
    i = pl.program_id(1)
    tm = out_ref.shape[0]
    row0 = pl.multiple_of(i * tm, tm)

    @pl.when(p == 0)
    def _copy_pass():
        e0 = ego0_ref[...]                                   # (TM, D) f32
        out_ref[...] = e0                                     # slab cols [0, D)
        ego_sc[0, pl.ds(row0, tm), :] = e0.astype(jnp.bfloat16)

    @pl.when(p > 0)
    def _layer_pass():
        layer = jnp.maximum(p - 1, 0)          # clamp keeps the traced index >= 0
        read_slot = layer % 2                  # layer L reads slot L % 2 ...
        write_slot = 1 - read_slot             # ... and writes slot (L + 1) % 2

        # side = A_hat[rows] @ ego_prev   (bf16 x bf16 on the MXU, f32 accumulate)
        side = jnp.dot(a_ref[...], ego_sc[read_slot],
                       preferred_element_type=jnp.float32)    # (TM, D) f32

        # bilinear term: ego_prev[rows] * side (f32 math on bf16-carried ego)
        ego_rows = ego_sc[read_slot, pl.ds(row0, tm), :].astype(jnp.float32)
        bi = ego_rows * side                                   # (TM, D) f32

        # Two accumulating projections (no in-kernel concatenate), bf16 MXU.
        x = jnp.dot(side.astype(jnp.bfloat16), wgc_ref[layer],
                    preferred_element_type=jnp.float32)
        x = x + jnp.dot(bi.astype(jnp.bfloat16), wbi_ref[layer],
                        preferred_element_type=jnp.float32)
        x = x + b_ref[layer]                                   # (TM, D) f32

        # LeakyReLU(negative_slope=0.2); mess_dropout treated as 0 (eval mode).
        x = jnp.where(x > 0, x, 0.2 * x)

        # Carry un-normalized ego embeddings (bf16) for layer L + 1.
        ego_sc[write_slot, pl.ds(row0, tm), :] = x.astype(jnp.bfloat16)

        # F.normalize(x, p=2, dim=1): clamp on sum-of-squares preserves torch's
        # 1e-12 norm clamp; rsqrt runs on the otherwise-idle EUP.
        sumsq = jnp.sum(x * x, axis=-1, keepdims=True)
        out_ref[...] = x * lax.rsqrt(jnp.maximum(sumsq, 1e-24))


def _select_config(n_nodes, d, k_layers):
    """Pick (tm, vmem_limit_bytes) from the TPU generation's VMEM capacity."""
    try:
        info = pltpu.get_tpu_info()
        vmem_cap = int(getattr(info, "vmem_capacity_bytes", 64 * 1024 * 1024))
    except Exception:  # non-TPU / older runtime: conservative fallback
        vmem_cap = 64 * 1024 * 1024
    vmem_cap = max(vmem_cap, 32 * 1024 * 1024)
    # ~15% headroom for Mosaic-internal scratch; cap below the 128 MiB parts.
    vmem_limit = min(int(vmem_cap * 0.85), 110 * 1024 * 1024)

    fixed = (2 * n_nodes * d * 2                 # bf16 ego ping-pong carry
             + 2 * 2 * k_layers * d * d * 2      # resident bf16 W_gc / W_bi
             + 2 * k_layers * d * 4              # biases
             + (1 << 20))                        # slack
    budget = max(vmem_limit - fixed, 2 * 1024 * 1024)

    tm = 8
    for cand in (512, 256, 128, 64, 32, 16, 8):
        if cand > n_nodes or n_nodes % cand:
            continue
        need = 2 * cand * n_nodes * 2 + 4 * cand * d * 4   # A strips + ego0/out tiles
        if need <= budget:
            tm = cand
            break
    return tm, vmem_limit


def ngcf_propagate(a_hat_bf16, ego0, w_gc_bf16, w_bi_bf16, b_sum, *, tm,
                   vmem_limit_bytes):
    """Runs the ego0 copy pass plus all K NGCF layers in one pallas_call.

    a_hat_bf16 : (N, N)    bf16  dense normalized adjacency
    ego0       : (N, D)    f32   concat(user_emb, item_emb)
    w_gc_bf16  : (K, D, D) bf16
    w_bi_bf16  : (K, D, D) bf16
    b_sum      : (K, 1, D) f32   b_gc + b_bi
    returns    : (N, (K+1)*D) f32  [ego0 | norm_1 | ... | norm_K] lane-concatenated
    """
    K, D, D2 = w_gc_bf16.shape
    N = ego0.shape[0]
    assert D == D2 and ego0.shape[1] == D
    assert N % tm == 0, "row tile TM must divide the node count"
    assert tm % 8 == 0 and D % 8 == 0
    # NOTE: D should be a multiple of 128 for lane-dense (unmasked) stores.

    return pl.pallas_call(
        _ngcf_kernel,
        out_shape=jax.ShapeDtypeStruct((N, (K + 1) * D), jnp.float32),
        grid_spec=pltpu.PrefetchScalarGridSpec(
            num_scalar_prefetch=0,
            grid=(K + 1, N // tm),                            # (pass, row tile)
            in_specs=[
                # A row strip; pinned to strip 0 during the copy pass so the
                # unchanged block index suppresses any extra DMA.
                pl.BlockSpec((tm, N),
                             lambda p, i: (jnp.where(p == 0, 0, i), 0)),
                # ego0 row tiles; only consumed during the copy pass.
                pl.BlockSpec((tm, D),
                             lambda p, i: (jnp.where(p == 0, i, 0), 0)),
                pl.BlockSpec((K, D, D), lambda p, i: (0, 0, 0)),   # W_gc (resident)
                pl.BlockSpec((K, D, D), lambda p, i: (0, 0, 0)),   # W_bi (resident)
                pl.BlockSpec((K, 1, D), lambda p, i: (0, 0, 0)),   # b_gc+b_bi
            ],
            out_specs=pl.BlockSpec((tm, D), lambda p, i: (i, p)),  # lane-dense slab
            scratch_shapes=[pltpu.VMEM((2, N, D), jnp.bfloat16)],  # ego ping-pong
        ),
        compiler_params=pltpu.CompilerParams(
            # Both axes carry state through the VMEM scratch -> "arbitrary".
            dimension_semantics=("arbitrary", "arbitrary"),
            vmem_limit_bytes=vmem_limit_bytes,
        ),
    )(a_hat_bf16, ego0, w_gc_bf16, w_bi_bf16, b_sum)


def ngcf_forward(a_hat, user_emb, item_emb, w_gc, b_gc, w_bi, b_bi,
                 users, pos_items, neg_items, *, tm=None, vmem_limit_bytes=None):
    n_user = user_emb.shape[0]
    ego0 = jnp.concatenate([user_emb, item_emb], axis=0)      # (N, D) f32
    K, D, _ = w_gc.shape
    N = ego0.shape[0]

    auto_tm, auto_vmem = _select_config(N, D, K)
    tm = auto_tm if tm is None else tm
    vmem_limit_bytes = auto_vmem if vmem_limit_bytes is None else vmem_limit_bytes

    a_bf16 = a_hat.astype(jnp.bfloat16)
    w_gc_b = w_gc.astype(jnp.bfloat16)
    w_bi_b = w_bi.astype(jnp.bfloat16)
    b_sum = (b_gc + b_bi).astype(jnp.float32)

    # all_embeddings = cat([ego0, norm_1, ..., norm_K], dim=1), emitted directly
    # by the kernel (no wrapper-side concat / extra HBM round-trip).
    all_emb = ngcf_propagate(a_bf16, ego0, w_gc_b, w_bi_b, b_sum,
                             tm=tm, vmem_limit_bytes=vmem_limit_bytes)

    u_g = all_emb[:n_user, :]
    i_g = all_emb[n_user:, :]
    # look-up (glue: plain JAX gather)
    return u_g[users, :], i_g[pos_items, :], i_g[neg_items, :]


def _ngcf_reference(a_hat, ego0, w_gc, b_gc, w_bi, b_bi):
    """Pure-JAX reference mirroring the kernel's bf16 numerics."""
    a_bf = a_hat.astype(jnp.bfloat16)
    wgc = w_gc.astype(jnp.bfloat16)
    wbi = w_bi.astype(jnp.bfloat16)
    ego_bf = ego0.astype(jnp.bfloat16)
    outs = [ego0]
    for k in range(w_gc.shape[0]):
        side = jnp.dot(a_bf, ego_bf, preferred_element_type=jnp.float32)
        bi = ego_bf.astype(jnp.float32) * side
        x = jnp.dot(side.astype(jnp.bfloat16), wgc[k],
                    preferred_element_type=jnp.float32)
        x = x + jnp.dot(bi.astype(jnp.bfloat16), wbi[k],
                        preferred_element_type=jnp.float32)
        x = x + (b_gc[k] + b_bi[k])
        x = jnp.where(x > 0, x, 0.2 * x)
        ego_bf = x.astype(jnp.bfloat16)
        sumsq = jnp.sum(x * x, axis=1, keepdims=True)
        outs.append(x * lax.rsqrt(jnp.maximum(sumsq, 1e-24)))
    return jnp.concatenate(outs, axis=1)


def _xavier_uniform(key, shape):
    fan_in, fan_out = shape[-2], shape[-1]
    bound = (6.0 / (fan_in + fan_out)) ** 0.5
    return jax.random.uniform(key, shape, minval=-bound, maxval=bound,
                              dtype=jnp.float32)


if __name__ == "__main__":
    # small, deterministic synthetic setup
    n_user, n_item = 112, 144         # N = 256 nodes -> 2 row tiles at tm=128
    emb_size = 128                    # D (lane-dense embedding width)
    K = 2                             # number of propagation layers
    batch = 8
    N = n_user + n_item

    key = jax.random.PRNGKey(0)
    ks = jax.random.split(key, 10)

    # parameters (Xavier uniform, deterministic)
    user_emb = _xavier_uniform(ks[0], (n_user, emb_size))
    item_emb = _xavier_uniform(ks[1], (n_item, emb_size))
    w_gc = jnp.stack([_xavier_uniform(kk, (emb_size, emb_size))
                      for kk in jax.random.split(ks[2], K)])
    b_gc = jnp.stack([_xavier_uniform(kk, (1, emb_size))
                      for kk in jax.random.split(ks[3], K)])
    w_bi = jnp.stack([_xavier_uniform(kk, (emb_size, emb_size))
                      for kk in jax.random.split(ks[4], K)])
    b_bi = jnp.stack([_xavier_uniform(kk, (1, emb_size))
                      for kk in jax.random.split(ks[5], K)])

    # synthetic symmetric-normalized bipartite adjacency (dense here; see the
    # sparse-SpMM TODO for real graphs)
    R = (jax.random.uniform(ks[6], (n_user, n_item)) < 0.15).astype(jnp.float32)
    A = jnp.zeros((N, N), dtype=jnp.float32)
    A = A.at[:n_user, n_user:].set(R)
    A = A.at[n_user:, :n_user].set(R.T)
    deg = A.sum(axis=1)
    d_inv_sqrt = jnp.where(deg > 0, 1.0 / jnp.sqrt(jnp.maximum(deg, 1e-12)), 0.0)
    a_hat = d_inv_sqrt[:, None] * A * d_inv_sqrt[None, :]

    # batch indices
    users = jax.random.randint(ks[7], (batch,), 0, n_user)
    pos_items = jax.random.randint(ks[8], (batch,), 0, n_item)
    neg_items = jax.random.randint(ks[9], (batch,), 0, n_item)

    # tm=128 exercises 2 row tiles at this small N; leave tm=None in production
    # to let _select_config pick the generation-specific (larger) tile.
    u_g, pos_g, neg_g = ngcf_forward(a_hat, user_emb, item_emb,
                                     w_gc, b_gc, w_bi, b_bi,
                                     users, pos_items, neg_items, tm=128)
    jax.block_until_ready((u_g, pos_g, neg_g))

    expected_dim = emb_size * (K + 1)
    assert u_g.shape == (batch, expected_dim)
    assert pos_g.shape == (batch, expected_dim)
    assert neg_g.shape == (batch, expected_dim)

    # correctness vs. pure-JAX reference mirroring the kernel's bf16 numerics
    ego0 = jnp.concatenate([user_emb, item_emb], axis=0)
    ref_all = _ngcf_reference(a_hat, ego0, w_gc, b_gc, w_bi, b_bi)
    ref_u = ref_all[:n_user][users]
    ref_p = ref_all[n_user:][pos_items]
    ref_n = ref_all[n_user:][neg_items]
    assert jnp.allclose(u_g, ref_u, atol=5e-3, rtol=5e-3)
    assert jnp.allclose(pos_g, ref_p, atol=5e-3, rtol=5e-3)
    assert jnp.allclose(neg_g, ref_n, atol=5e-3, rtol=5e-3)
    assert bool(jnp.all(jnp.isfinite(u_g)))
    assert bool(jnp.all(jnp.isfinite(pos_g)))
    assert bool(jnp.all(jnp.isfinite(neg_g)))

    print("KERNEL_OK")
</pallas_src>

<mosaic_0001>
module attributes {stable_mosaic.version = 11 : i64} {
  func.func @_ngcf_kernel(%arg0: i32, %arg1: i32, %arg2: memref<128x256xbf16, #tpu.memory_space<vmem>>, %arg3: memref<128x128xf32, #tpu.memory_space<vmem>>, %arg4: memref<2x128x128xbf16, #tpu.memory_space<vmem>>, %arg5: memref<2x128x128xbf16, #tpu.memory_space<vmem>>, %arg6: memref<2x1x128xf32, #tpu.memory_space<vmem>>, %arg7: memref<128x128xf32, #tpu.memory_space<vmem>>, %arg8: memref<2x256x128xbf16, #tpu.memory_space<vmem>>) attributes {dimension_semantics = [#tpu.dimension_semantics<arbitrary>, #tpu.dimension_semantics<arbitrary>], iteration_bounds = array<i64: 3, 2>, scalar_prefetch = 0 : i64, scratch_operands = 1 : i64, tpu.core_type = #tpu.core_type<tc>, window_params = [{transform_indices = @transform_0, window_bounds = array<i64: 128, 256>}, {transform_indices = @transform_1, window_bounds = array<i64: 128, 128>}, {pipeline_mode = #tpu.pipeline_mode<synchronous>, transform_indices = @transform_2, window_bounds = array<i64: 2, 128, 128>}, {pipeline_mode = #tpu.pipeline_mode<synchronous>, transform_indices = @transform_3, window_bounds = array<i64: 2, 128, 128>}, {pipeline_mode = #tpu.pipeline_mode<synchronous>, transform_indices = @transform_4, window_bounds = array<i64: 2, 1, 128>}, {transform_indices = @transform_5, window_bounds = array<i64: 128, 128>}]} {
    %c128_i32 = arith.constant 128 : i32
    %0 = arith.muli %arg1, %c128_i32 : i32
    %1 = tpu.assume_multiple %0, 128 : i32
    %c0_i32 = arith.constant 0 : i32
    %2 = arith.cmpi eq, %arg0, %c0_i32 : i32
    %3 = arith.extui %2 : i1 to i32
    %c0_i32_0 = arith.constant 0 : i32
    %4 = arith.cmpi ne, %3, %c0_i32_0 : i32
    scf.if %4 {
      %c0 = arith.constant 0 : index
      %c0_3 = arith.constant 0 : index
      %8 = vector.load %arg3[%c0, %c0_3] : memref<128x128xf32, #tpu.memory_space<vmem>>, vector<128x128xf32>
      %c0_4 = arith.constant 0 : index
      %c0_5 = arith.constant 0 : index
      %9 = vector.load %arg7[%c0_4, %c0_5] : memref<128x128xf32, #tpu.memory_space<vmem>>, vector<128x128xf32>
      tpu.vector_store %arg7[%c0_4, %c0_5], %8 {strides = array<i32>} : memref<128x128xf32, #tpu.memory_space<vmem>>, vector<128x128xf32>,
      %10 = arith.truncf %8 : vector<128x128xf32> to vector<128x128xbf16>
      %c0_6 = arith.constant 0 : index
      %11 = arith.index_cast %1 : i32 to index
      %c0_7 = arith.constant 0 : index
      %12 = vector.load %arg8[%c0_6, %11, %c0_7] : memref<2x256x128xbf16, #tpu.memory_space<vmem>>, vector<1x128x128xbf16>
      %13 = vector.shape_cast %12 : vector<1x128x128xbf16> to vector<128x128xbf16>
      %14 = vector.shape_cast %10 : vector<128x128xbf16> to vector<1x128x128xbf16>
      tpu.vector_store %arg8[%c0_6, %11, %c0_7], %14 {strides = array<i32>} : memref<2x256x128xbf16, #tpu.memory_space<vmem>>, vector<1x128x128xbf16>,
    } else {
    }
    %c0_i32_1 = arith.constant 0 : i32
    %5 = arith.cmpi sgt, %arg0, %c0_i32_1 : i32
    %6 = arith.extui %5 : i1 to i32
    %c0_i32_2 = arith.constant 0 : i32
    %7 = arith.cmpi ne, %6, %c0_i32_2 : i32
    scf.if %7 {
      %c1_i32 = arith.constant 1 : i32
      %8 = arith.subi %arg0, %c1_i32 : i32
      %c0_i32_3 = arith.constant 0 : i32
      %9 = arith.maxsi %8, %c0_i32_3 : i32
      %c2_i32 = arith.constant 2 : i32
      %c0_i32_4 = arith.constant 0 : i32
      %10 = arith.cmpi eq, %c2_i32, %c0_i32_4 : i32
      %c1_i32_5 = arith.constant 1 : i32
      %11 = arith.select %10, %c1_i32_5, %c2_i32 : i32
      %12 = arith.remsi %9, %11 : i32
      %c0_i32_6 = arith.constant 0 : i32
      %13 = arith.cmpi ne, %12, %c0_i32_6 : i32
      %c0_i32_7 = arith.constant 0 : i32
      %14 = arith.cmpi slt, %12, %c0_i32_7 : i32
      %c0_i32_8 = arith.constant 0 : i32
      %15 = arith.cmpi slt, %11, %c0_i32_8 : i32
      %16 = arith.xori %14, %15 : i1
      %17 = arith.andi %16, %13 : i1
      %18 = arith.addi %12, %11 : i32
      %19 = arith.select %17, %18, %12 : i32
      %c1_i32_9 = arith.constant 1 : i32
      %20 = arith.subi %c1_i32_9, %19 : i32
      %c0 = arith.constant 0 : index
      %c0_10 = arith.constant 0 : index
      %21 = vector.load %arg2[%c0, %c0_10] : memref<128x256xbf16, #tpu.memory_space<vmem>>, vector<128x256xbf16>
      %22 = arith.index_cast %19 : i32 to index
      %c0_11 = arith.constant 0 : index
      %c0_12 = arith.constant 0 : index
      %23 = vector.load %arg8[%22, %c0_11, %c0_12] : memref<2x256x128xbf16, #tpu.memory_space<vmem>>, vector<1x256x128xbf16>
      %24 = vector.shape_cast %23 : vector<1x256x128xbf16> to vector<256x128xbf16>
      %cst = arith.constant dense<0.000000e+00> : vector<128x128xf32>
      %25 = tpu.matmul %21, %24, %cst {dimension_numbers = #tpu.dot_dimension_numbers<[1], [0], [0], [1], [0, 0, 1, 1], [], []>} : vector<128x256xbf16>, vector<256x128xbf16>, vector<128x128xf32> -> vector<128x128xf32>
      %26 = arith.index_cast %19 : i32 to index
      %27 = arith.index_cast %1 : i32 to index
      %c0_13 = arith.constant 0 : index
      %28 = vector.load %arg8[%26, %27, %c0_13] : memref<2x256x128xbf16, #tpu.memory_space<vmem>>, vector<1x128x128xbf16>
      %29 = vector.shape_cast %28 : vector<1x128x128xbf16> to vector<128x128xbf16>
      %30 = arith.extf %29 : vector<128x128xbf16> to vector<128x128xf32>
      %31 = arith.mulf %30, %25 : vector<128x128xf32>
      %32 = arith.truncf %25 : vector<128x128xf32> to vector<128x128xbf16>
      %33 = arith.index_cast %9 : i32 to index
      %c0_14 = arith.constant 0 : index
      %c0_15 = arith.constant 0 : index
      %34 = vector.load %arg4[%33, %c0_14, %c0_15] : memref<2x128x128xbf16, #tpu.memory_space<vmem>>, vector<1x128x128xbf16>
      %35 = vector.shape_cast %34 : vector<1x128x128xbf16> to vector<128x128xbf16>
      %cst_16 = arith.constant dense<0.000000e+00> : vector<128x128xf32>
      %36 = tpu.matmul %32, %35, %cst_16 {dimension_numbers = #tpu.dot_dimension_numbers<[1], [0], [0], [1], [0, 0, 1, 1], [], []>} : vector<128x128xbf16>, vector<128x128xbf16>, vector<128x128xf32> -> vector<128x128xf32>
      %37 = arith.truncf %31 : vector<128x128xf32> to vector<128x128xbf16>
      %38 = arith.index_cast %9 : i32 to index
      %c0_17 = arith.constant 0 : index
      %c0_18 = arith.constant 0 : index
      %39 = vector.load %arg5[%38, %c0_17, %c0_18] : memref<2x128x128xbf16, #tpu.memory_space<vmem>>, vector<1x128x128xbf16>
      %40 = vector.shape_cast %39 : vector<1x128x128xbf16> to vector<128x128xbf16>
      %cst_19 = arith.constant dense<0.000000e+00> : vector<128x128xf32>
      %41 = tpu.matmul %37, %40, %cst_19 {dimension_numbers = #tpu.dot_dimension_numbers<[1], [0], [0], [1], [0, 0, 1, 1], [], []>} : vector<128x128xbf16>, vector<128x128xbf16>, vector<128x128xf32> -> vector<128x128xf32>
      %42 = arith.addf %36, %41 : vector<128x128xf32>
      %43 = arith.index_cast %9 : i32 to index
      %c0_20 = arith.constant 0 : index
      %c0_21 = arith.constant 0 : index
      %44 = vector.load %arg6[%43, %c0_20, %c0_21] : memref<2x1x128xf32, #tpu.memory_space<vmem>>, vector<1x1x128xf32>
      %45 = vector.shape_cast %44 : vector<1x1x128xf32> to vector<1x128xf32>
      %46 = vector.broadcast %45 : vector<1x128xf32> to vector<128x128xf32>
      %47 = arith.addf %42, %46 : vector<128x128xf32>
      %cst_22 = arith.constant 0.000000e+00 : f32
      %48 = vector.broadcast %cst_22 : f32 to vector<128x128xf32>
      %49 = arith.cmpf ogt, %47, %48 : vector<128x128xf32>
      %cst_23 = arith.constant 2.000000e-01 : f32
      %50 = vector.broadcast %cst_23 : f32 to vector<128x128xf32>
      %51 = arith.mulf %50, %47 : vector<128x128xf32>
      %52 = arith.select %49, %47, %51 : vector<128x128xi1>, vector<128x128xf32>
      %53 = arith.truncf %52 : vector<128x128xf32> to vector<128x128xbf16>
      %54 = arith.index_cast %20 : i32 to index
      %55 = arith.index_cast %1 : i32 to index
      %c0_24 = arith.constant 0 : index
      %56 = vector.load %arg8[%54, %55, %c0_24] : memref<2x256x128xbf16, #tpu.memory_space<vmem>>, vector<1x128x128xbf16>
      %57 = vector.shape_cast %56 : vector<1x128x128xbf16> to vector<128x128xbf16>
      %58 = vector.shape_cast %53 : vector<128x128xbf16> to vector<1x128x128xbf16>
      tpu.vector_store %arg8[%54, %55, %c0_24], %58 {strides = array<i32>} : memref<2x256x128xbf16, #tpu.memory_space<vmem>>, vector<1x128x128xbf16>,
      %59 = arith.mulf %52, %52 : vector<128x128xf32>
      %cst_25 = arith.constant dense<0.000000e+00> : vector<128xf32>
      %60 = vector.multi_reduction <add>, %59, %cst_25 [1] : vector<128x128xf32> to vector<128xf32>
      %61 = vector.shape_cast %60 : vector<128xf32> to vector<128x1xf32>
      %cst_26 = arith.constant 1.000000e-24 : f32
      %62 = vector.broadcast %cst_26 : f32 to vector<128x1xf32>
      %63 = arith.maximumf %61, %62 : vector<128x1xf32>
      %64 = math.rsqrt %63 : vector<128x1xf32>
      %65 = vector.broadcast %64 : vector<128x1xf32> to vector<128x128xf32>
      %66 = arith.mulf %52, %65 : vector<128x128xf32>
      %c0_27 = arith.constant 0 : index
      %c0_28 = arith.constant 0 : index
      %67 = vector.load %arg7[%c0_27, %c0_28] : memref<128x128xf32, #tpu.memory_space<vmem>>, vector<128x128xf32>
      tpu.vector_store %arg7[%c0_27, %c0_28], %66 {strides = array<i32>} : memref<128x128xf32, #tpu.memory_space<vmem>>, vector<128x128xf32>,
    } else {
    }
    return
  }
  func.func @transform_0(%arg0: i32, %arg1: i32) -> (i32, i32) {
    %c0_i32 = arith.constant 0 : i32
    %0 = arith.cmpi eq, %arg0, %c0_i32 : i32
    %c0_i32_0 = arith.constant 0 : i32
    %1 = arith.select %0, %c0_i32_0, %arg1 : i32
    %c0_i32_1 = arith.constant 0 : i32
    %c0_i32_2 = arith.constant 0 : i32
    return %1, %c0_i32_1 : i32, i32
  }
  func.func @transform_1(%arg0: i32, %arg1: i32) -> (i32, i32) {
    %c0_i32 = arith.constant 0 : i32
    %0 = arith.cmpi eq, %arg0, %c0_i32 : i32
    %c0_i32_0 = arith.constant 0 : i32
    %1 = arith.select %0, %arg1, %c0_i32_0 : i32
    %c0_i32_1 = arith.constant 0 : i32
    %c0_i32_2 = arith.constant 0 : i32
    return %1, %c0_i32_1 : i32, i32
  }
  func.func @transform_2(%arg0: i32, %arg1: i32) -> (i32, i32, i32) {
    %c0_i32 = arith.constant 0 : i32
    %c0_i32_0 = arith.constant 0 : i32
    %c0_i32_1 = arith.constant 0 : i32
    %c0_i32_2 = arith.constant 0 : i32
    return %c0_i32, %c0_i32_0, %c0_i32_1 : i32, i32, i32
  }
  func.func @transform_3(%arg0: i32, %arg1: i32) -> (i32, i32, i32) {
    %c0_i32 = arith.constant 0 : i32
    %c0_i32_0 = arith.constant 0 : i32
    %c0_i32_1 = arith.constant 0 : i32
    %c0_i32_2 = arith.constant 0 : i32
    return %c0_i32, %c0_i32_0, %c0_i32_1 : i32, i32, i32
  }
  func.func @transform_4(%arg0: i32, %arg1: i32) -> (i32, i32, i32) {
    %c0_i32 = arith.constant 0 : i32
    %c0_i32_0 = arith.constant 0 : i32
    %c0_i32_1 = arith.constant 0 : i32
    %c0_i32_2 = arith.constant 0 : i32
    return %c0_i32, %c0_i32_0, %c0_i32_1 : i32, i32, i32
  }
  func.func @transform_5(%arg0: i32, %arg1: i32) -> (i32, i32) {
    %c0_i32 = arith.constant 0 : i32
    return %arg1, %arg0 : i32, i32
  }
}

</mosaic_0001>

<bundles_post_ra>
// kernel: tpu_custom_call.1
= control target key start
LH: loop header
LB: loop body
LE: loop exit
PB: predicated region body
PF: predicated region fallthrough
CT: control target
= control target key end

     0   :  { %s2934_s0 = inlined_call_operand.hbm [shape: bf16[256,256], index: 0, kind: input, shape index: {}]   ;;  %s2935_s1 = inlined_call_operand.hbm [shape: f32[256,128], index: 1, kind: input, shape index: {}]   ;;  %s2936_s2 = inlined_call_operand.hbm [shape: bf16[2,128,128], index: 2, kind: input, shape index: {}]   ;;  %s2937_s3 = inlined_call_operand.hbm [shape: bf16[2,128,128], index: 3, kind: input, shape index: {}]   ;;  %s2938_s4 = inlined_call_operand.vmem [shape: f32[2,1,128], index: 4, kind: input, shape index: {}]   ;;  %s2939_s5 = inlined_call_operand.hbm [shape: f32[256,384], index: 5, kind: output, shape index: {}]  }
   0x1   :  { %2959 = sst [smem:[#allocation25_spill]] %s2934_s0 }
   0x2   :  { %2960 = sst [smem:[#allocation26_spill]] %s2936_s2 }
   0x3   :  { %2961 = sst [smem:[#allocation27_spill]] %s2937_s3 }
   0x4   :  { %2962 = sst [smem:[#allocation28_spill]] %s2938_s4 }
   0x5   :  { %2963 = sst [smem:[#allocation29_spill]] %s2939_s5 }
   0x6   :  { %10 = vsyncpa [#allocation4], 0 }
   0x7   :  { %12 = vsyncpa [#allocation4 + $0x1], 0 }
   0x8   :  { %13 = vsyncpa [#allocation7], 0 }
   0x9   :  { %15 = vsyncpa [#allocation7 + $0x1], 0 }
   0xa   :  { %16 = vsyncpa [#allocation10], 0 }
   0xb   :  { %17 = vsyncpa [#allocation5], 0 }
   0xc   :  { %19 = vsyncpa [#allocation5 + $0x1], 0  ;;  %s2200_s18 = smov 0   ;;  %s2202_s19 = smov 0  }
   0xd   :  { %s2204_s20 = smov 0   ;;  %s2206_s21 = smov 0  }
   0xe   :  { %s2208_s22 = smov 0   ;;  %s2210_s23 = smov 0  }
   0xf   :  { %s2212_s24 = smov 0   ;;  %s2214_s25 = smov 0  }
  0x10   :  { %s2216_s26 = smov 0   ;;  %s2218_s27 = smov 0  }
  0x11   :  { %s2220_s28 = smov 0   ;;  %s2222_s29 = smov 0  }
  0x12   :  { %s2224_s30 = smov 0   ;;  %s2226_s6 = smov 0  }
  0x13 LB: > { %2964 = sst [smem:[#allocation17_spill]] %s2104_s18  ;;  %s2267_s7 = sadd.s32 4294967295, %s2156_s6   ;;  %s2156_s6 = sphi %s2226_s6, %s25_s6   ;;  %s2152_s30 = sphi %s2224_s30, %s3028_s30   ;;  %s2148_s29 = sphi %s2222_s29, %s3027_s29   ;;  %s2144_s28 = sphi %s2220_s28, %s3026_s28   ;;  %s2140_s27 = sphi %s2218_s27, %s3025_s27   ;;  %s2136_s26 = sphi %s2216_s26, %s3024_s26   ;;  %s2132_s25 = sphi %s2214_s25, %s3023_s25   ;;  %s2128_s24 = sphi %s2212_s24, %s3022_s24   ;;  %s2124_s23 = sphi %s2210_s23, %s3021_s23   ;;  %s2120_s22 = sphi %s2208_s22, %s3020_s22   ;;  %s2116_s21 = sphi %s2206_s21, %s3019_s21   ;;  %s2112_s20 = sphi %s2204_s20, %s3018_s20   ;;  %s2108_s19 = sphi %s2202_s19, %s3017_s19   ;;  %s2104_s18 = sphi %s2200_s18, %s3015_s18  }
  0x14   : > { %2965 = sst [smem:[#allocation18_spill]] %s2108_s19  ;;  %s1390_s8 = sadd.s32 4294967294, %s2156_s6  }
  0x15   : > { %2966 = sst [smem:[#allocation19_spill]] %s2140_s27  ;;  %p61_p0 = scmp.ne.s32.totalorder %s2132_s25, %s2128_s24 }
  0x16   : > { %2967 = sst [smem:[#allocation20_spill]] %s2144_s28  ;;  %p2945_p1 = scmp.eq.s32.totalorder %s2267_s7, 0 }
  0x17   : > { %2968 = sst [smem:[#allocation21_spill]] %s2267_s7  ;;  %p91_p2 = scmp.ne.s32.totalorder %s2120_s22, %s2116_s21 }
  0x18   : > { %p2276_p3 = por %p2945_p1, %p61_p0  ;;  %p179_p4 = scmp.ne.s32.totalorder %s2112_s20, %s2108_s19 }
  0x19   : > { %p2284_p5 = por %p91_p2, %p2945_p1  ;;  %p180_p6 = scmp.eq.s32.totalorder %s2267_s7, 5 }
  0x1a   : > { %s2969_s10 = scalar_select %p2276_p3, 1, 0 }
  0x1b   : > { %s2970_s11 = scalar_select %p2284_p5, 1, 0 }
  0x1c   : > { %p185_p7 = scmp.ne.s32.totalorder %s2108_s19, %s2104_s18  ;;  %p186_p8 = scmp.eq.s32.totalorder %s1390_s8, 5 }
  0x1d   : > { %2971 = sst [smem:[#allocation22_spill]] %s2970_s11  ;;  %p2291_p9 = por %p180_p6, %p179_p4 }
  0x1e   : > { %p1391_p10 = scmp.ge.s32.totalorder %s2156_s6, 1  ;;  %p2296_p11 = por %p186_p8, %p185_p7 }
  0x1f   : > { %s2972_s12 = scalar_select %p2291_p9, 1, 0 }
  0x20   : > { %s2974_s13 = scalar_select %p2296_p11, 1, 0 }
  0x21   : > { %2973 = sst [smem:[#allocation23_spill]] %s2972_s12  ;;  %p193_p12 = scmp.lt.s32.totalorder %s2156_s6, 7 }
  0x22   : > { %2975 = sst [smem:[#allocation24_spill]] %s2974_s13  ;;  %s2158_s15 = smov [#allocation8]  }
  0x23   : > { %p2301_p13 = pnand %p1391_p10, %p193_p12  ;;  %s205_s16 = sshll.u32 %s2158_s15, 4  ;;  %s206_s16 = int_to_ptr.vmem [resolvable:$true] %s205_s16 }
  0x24   : > { %s2159_s21 = smov [#allocation9]   ;;  %s2978_s2 = sld [smem:[#allocation26_spill]] }
  0x25   : > { %s2976_s14 = scalar_select %p2301_p13, 1, 0 }
  0x26   : > { %p1665_p0 = pneg %p2301_p13  ;;  %s218_s24 = sshll.u32 %s2159_s21, 4  ;;  %s2313_s24 = int_to_ptr.vmem [resolvable:$true] %s218_s24 }
  0x28   : > { %p2309_p2 = pnand %p1665_p0, %p2945_p1 }
  0x2a   : > { %s1882_s13 = scalar_lea.hbm %s2978_s2, 2048  ;;  %p1884_p6 = pneg %p2309_p2 }
  0x2b   : > { %p1883_p4 = scmp.ne.s32.totalorder %s2978_s2, %s1882_s13  ;;  %p1889_p10 = scmp.lt.u32.totalorder %s1882_s13, %s2978_s2 }
  0x2d   : > { %p1885_p7 = pnand %p1884_p6, %p1883_p4 }
  0x2f   : > { %p1886_p8 = pneg %p1885_p7 }
  0x31   : > { %p1891_p12 = pnand %p1889_p10, %p1886_p8 }
  0x33   : > { %1894 = shalt.err (!%p1891_p12)
}
  0x34   : > { %s1895_s21 = scalar_lea.vmem %s206_s16, 2048  ;;  %p1903_p9 = scmp.lt.s32.totalorder %s206_s16, %s206_s16 }
  0x35   : > { %p1896_p0 = scmp.ne.s32.totalorder %s206_s16, %s1895_s21  ;;  %p1904_p5 = scmp.lt.s32.totalorder %s1895_s21, %s1895_s21 }
  0x37   : > { %p1898_p1 = pnand %p1896_p0, %p1884_p6  ;;  %p1905_p3 = por %p1904_p5, %p1903_p9 }
  0x39   : > { %p1899_p11 = pneg %p1898_p1 }
  0x3b   : > { %p1906_p13 = pnand %p1905_p3, %p1899_p11 }
  0x3d   : > { %1909 = shalt.err (!%p1906_p13)
}
  0x3e   : > { %s2160_s18 = smov 64   ;;  %s2161_s9 = smov 4  }
  0x3f   : > { %1668 = dma.hbm_to_vmem [thread:$0]  (!%p2309_p2), %s2978_s2, 2048, %s206_s16, [#allocation7], %s2160_s18, %s2160_s18, %s2161_s9  }
  0x40   : > { %s2979_s3 = sld [smem:[#allocation27_spill]] }
  0x46   : > { %s1910_s15 = scalar_lea.hbm %s2979_s3, 2048 }
  0x47   : > { %p1911_p1 = scmp.ne.s32.totalorder %s2979_s3, %s1910_s15  ;;  %p1917_p9 = scmp.lt.u32.totalorder %s1910_s15, %s2979_s3 }
  0x49   : > { %p1913_p3 = pnand %p1911_p1, %p1884_p6 }
  0x4b   : > { %p1914_p5 = pneg %p1913_p3 }
  0x4d   : > { %p1919_p11 = pnand %p1917_p9, %p1914_p5 }
  0x4f   : > { %1922 = shalt.err (!%p1919_p11)
}
  0x50   : > { %s1923_s16 = scalar_lea.vmem %s2313_s24, 2048  ;;  %p1931_p8 = scmp.lt.s32.totalorder %s2313_s24, %s2313_s24 }
  0x51   : > { %p1924_p13 = scmp.ne.s32.totalorder %s2313_s24, %s1923_s16  ;;  %p1932_p10 = scmp.lt.s32.totalorder %s1923_s16, %s1923_s16 }
  0x53   : > { %p1926_p4 = pnand %p1924_p13, %p1884_p6  ;;  %p1933_p12 = por %p1932_p10, %p1931_p8 }
  0x55   : > { %p1927_p7 = pneg %p1926_p4 }
  0x57   : > { %p1934_p0 = pnand %p1933_p12, %p1927_p7 }
  0x59   : > { %1937 = shalt.err (!%p1934_p0)
}
  0x5a   : > { %1671 = dma.hbm_to_vmem [thread:$0]  (!%p2309_p2), %s2979_s3, 2048, %s2313_s24, [#allocation10], %s2160_s18, %s2160_s18, %s2161_s9  }
  0x5b   : > { %s34_s28 = sadd.s32 1, %s2148_s29  ;;  %s37_s17 = sadd.s32 1, %s2152_s30 }
  0x5c   : > { %p35_p6 = scmp.ge.s32.totalorder %s34_s28, 2  ;;  %p41_p1 = scmp.eq.s32.totalorder %s2152_s30, 0 }
  0x5d   : > { %s48_s5 = sadd.s32 1, %s2136_s26  ;;  %p55_p3 = scmp.ne.s32.totalorder %s2136_s26, %s2132_s25 }
  0x5e   : > { %s3030_s28 = smov (%p35_p6, %s34_s28), 0  ;;  %s3032_s17 = smov (!%p35_p6, %s37_s17), %s2152_s30 }
  0x5f   : > { %s42_s12 = scalar_select %p41_p1, 0, %s2148_s29 }
  0x60   : > { %p39_p5 = scmp.ge.s32.totalorder %s3032_s17, 3  ;;  %p2957_p9 = scmp.eq.s32.totalorder %s2156_s6, 0 }
  0x61   : > { %s164_s24 = ssub.s32 %s2148_s29, %s3030_s28  ;;  %p2956_p2 = scmp.lt.s32.totalorder %s2156_s6, 6 }
  0x62   : > { %s3034_s17 = smov (%p39_p5, %s3032_s17), 0  ;;  %p2382_p11 = por %p2957_p9, %p55_p3 }
  0x63   : > { %s235_s9 = sand.u32 1, %s2136_s26   ;;  %p2958_p13 = scmp.eq.s32.totalorder %s3034_s17, 0 }
  0x64   : > { %s165_s13 = ssub.s32 %s2152_s30, %s3034_s17  ;;  %s1395_s21 = sshll.u32 %s235_s9, 7 }
  0x65   : > { %s166_s8 = sor.u32 %s165_s13, %s164_s24  ;;  %s1469_s4 = sshll.u32 %s42_s12, 11 }
  0x66   : > { %s44_s15 = scalar_select %p2958_p13, 0, %s3030_s28 }
  0x67   : > { %p167_p4 = scmp.eq.s32.totalorder %s166_s8, 0  ;;  %s2981_s27 = sadd.s32 1, %s2112_s20 }
  0x68   : > { %s45_s16 = ssub.s32 %s42_s12, %s44_s15  ;;  %s2982_s0 = sld [smem:[#allocation25_spill]] }
  0x69   : > { %p46_p7 = scmp.eq.s32.totalorder %s45_s16, 0  ;;  %s239_s24 = scalar_lea.vmem [#allocation3], %s1395_s21 }
  0x6a   : > { %s2396_s2 = scalar_select %p167_p4, %s2112_s20, %s2981_s27  }
  0x6b   : > { %s2399_s3 = scalar_select %p46_p7, %s2136_s26, %s48_s5  }
  0x6c   : > { %s249_s13 = sshll.u32 %s239_s24, 4  ;;  %p2412_p8 = pnand %p2956_p2, %p2382_p11  ;;  %s2406_s13 = int_to_ptr.vmem [resolvable:$true] %s249_s13 }
  0x6d   : > { %s2416_s5 = scalar_lea.sflag [#allocation4], %s235_s9 }
  0x6e   : > { %s2404_s7 = scalar_lea.hbm %s2982_s0, %s1469_s4  ;;  %p1940_p12 = pneg %p2412_p8 }
  0x6f   : > { %s1938_s19 = scalar_lea.hbm %s2404_s7, 2048  ;;  %s1943_s18 = scalar_lea.hbm %s2982_s0, 4096 }
  0x70   : > { %p1939_p10 = scmp.ne.s32.totalorder %s2404_s7, %s1938_s19  ;;  %p1944_p3 = scmp.lt.u32.totalorder %s2404_s7, %s2982_s0 }
  0x71   : > { %p1945_p5 = scmp.lt.u32.totalorder %s1943_s18, %s1938_s19  ;;  %p1947_p4 = scmp.lt.u32.totalorder %s1938_s19, %s2404_s7 }
  0x72   : > { %p1941_p0 = pnand %p1940_p12, %p1939_p10 }
  0x73   : > { %p1946_p11 = por %p1945_p5, %p1944_p3 }
  0x74   : > { %p1942_p6 = pneg %p1941_p0 }
  0x75   : > { %p1948_p7 = por %p1947_p4, %p1946_p11 }
  0x77   : > { %p1949_p2 = pnand %p1948_p7, %p1942_p6 }
  0x79   : > { %1952 = shalt.err (!%p1949_p2)
}
  0x7a   : > { %s1953_s9 = scalar_lea.vmem %s2406_s13, 2048  ;;  %s2162_s16 = smov [#allocation3]  }
  0x7b   : > { %p1954_p10 = scmp.ne.s32.totalorder %s2406_s13, %s1953_s9  ;;  %s1958_s4 = sshll.u32 %s2162_s16, 4  ;;  %s1959_s4 = int_to_ptr.vmem [resolvable:$false] %s1958_s4 }
  0x7c   : > { %s1960_s27 = scalar_lea.vmem %s1959_s4, 4096  ;;  %p1961_p13 = scmp.lt.s32.totalorder %s2406_s13, %s1959_s4 }
  0x7d   : > { %p1956_p0 = pnand %p1954_p10, %p1940_p12  ;;  %p1962_p3 = scmp.lt.s32.totalorder %s1960_s27, %s1953_s9 }
  0x7f   : > { %p1957_p9 = pneg %p1956_p0  ;;  %p1963_p5 = por %p1962_p3, %p1961_p13 }
  0x81   : > { %p1964_p11 = pnand %p1963_p5, %p1957_p9 }
  0x83   : > { %1967 = shalt.err (!%p1964_p11)
}
  0x84   : > { %s2163_s24 = smov 128   ;;  %s2164_s19 = smov 8  }
  0x85   : > { %1675 = dma.hbm_to_vmem [thread:$0]  (!%p2412_p8), %s2404_s7, 2048, %s2406_s13, %s2416_s5, %s2163_s24, %s2163_s24, %s2164_s19  }
  0x86   : > { %s259_s11 = sand.u32 1, %s2156_s6   ;;  %p2984_p9 = scmp.eq.s32.totalorder %s3034_s17, 0 }
  0x87   : > { %s72_s8 = scalar_select %p41_p1, %s2148_s29, 0 }
  0x88   : > { %s74_s18 = scalar_select %p2984_p9, %s3030_s28, 0 }
  0x89   : > { %s78_s15 = sadd.s32 1, %s2124_s23  ;;  %p85_p2 = scmp.ne.s32.totalorder %s2124_s23, %s2120_s22 }
  0x8a   : > { %s75_s21 = ssub.s32 %s72_s8, %s74_s18  ;;  %p2985_p12 = scmp.eq.s32.totalorder %s2156_s6, 0 }
  0x8b   : > { %p76_p13 = scmp.eq.s32.totalorder %s75_s21, 0  ;;  %s261_s9 = sand.u32 1, %s2124_s23  }
  0x8c   : > { %p87_p6 = por %p85_p2, %p2985_p12  ;;  %s1470_s16 = sshll.u32 %s72_s8, 11 }
  0x8d   : > { %s2461_s4 = scalar_select %p76_p13, %s2124_s23, %s78_s15  }
  0x8e   : > { %s1399_s12 = sshll.u32 %s261_s9, 7  ;;  %s2466_s7 = scalar_lea.hbm %s2935_s1, %s1470_s16 }
  0x8f   : > { %p2986_p8 = scmp.lt.s32.totalorder %s2156_s6, 6  ;;  %s263_s5 = scalar_lea.vmem [#allocation6], %s1399_s12 }
  0x90   : > { %s272_s8 = sshll.u32 %s263_s5, 4  ;;  %s2476_s18 = scalar_lea.sflag [#allocation7], %s259_s11  ;;  %s2474_s8 = int_to_ptr.vmem [resolvable:$true] %s272_s8 }
  0x91   : > { %p2470_p1 = pnand %p2986_p8, %p87_p6  ;;  %s1968_s0 = scalar_lea.hbm %s2466_s7, 2048 }
  0x92   : > { %p1969_p4 = scmp.ne.s32.totalorder %s2466_s7, %s1968_s0  ;;  %s1973_s9 = scalar_lea.hbm %s2935_s1, 4096 }
  0x93   : > { %p1970_p7 = pneg %p2470_p1  ;;  %p1974_p3 = scmp.lt.u32.totalorder %s2466_s7, %s2935_s1 }
  0x94   : > { %p1975_p5 = scmp.lt.u32.totalorder %s1973_s9, %s1968_s0  ;;  %p1977_p9 = scmp.lt.u32.totalorder %s1968_s0, %s2466_s7 }
  0x95   : > { %p1971_p10 = pnand %p1970_p7, %p1969_p4 }
  0x96   : > { %p1976_p11 = por %p1975_p5, %p1974_p3 }
  0x97   : > { %p1972_p0 = pneg %p1971_p10 }
  0x98   : > { %p1978_p2 = por %p1977_p9, %p1976_p11 }
  0x9a   : > { %p1979_p13 = pnand %p1978_p2, %p1972_p0 }
  0x9c   : > { %1982 = shalt.err (!%p1979_p13)
}
  0x9d   : > { %s1983_s11 = scalar_lea.vmem %s2474_s8, 2048  ;;  %s2165_s12 = smov [#allocation6]  }
  0x9e   : > { %p1984_p12 = scmp.ne.s32.totalorder %s2474_s8, %s1983_s11  ;;  %s1988_s5 = sshll.u32 %s2165_s12, 4  ;;  %s1989_s5 = int_to_ptr.vmem [resolvable:$false] %s1988_s5 }
  0x9f   : > { %s1990_s15 = scalar_lea.vmem %s1989_s5, 4096  ;;  %p1991_p4 = scmp.lt.s32.totalorder %s2474_s8, %s1989_s5 }
  0xa0   : > { %p1986_p6 = pnand %p1984_p12, %p1970_p7  ;;  %p1992_p10 = scmp.lt.s32.totalorder %s1990_s15, %s1983_s11 }
  0xa2   : > { %p1987_p8 = pneg %p1986_p6  ;;  %p1993_p3 = por %p1992_p10, %p1991_p4 }
  0xa4   : > { %p1994_p5 = pnand %p1993_p3, %p1987_p8 }
  0xa6   : > { %1997 = shalt.err (!%p1994_p5)
}
  0xa7   : > { %1678 = dma.hbm_to_vmem [thread:$0]  (!%p2470_p1), %s2466_s7, 2048, %s2474_s8, %s2476_s18, %s2163_s24, %s2163_s24, %s2164_s19  }
  0xa8   : > { %p2988_p7 = scmp.ne.s32.totalorder %s2976_s14, 0 }
  0xa9   : > { %s286_s0 = sand.u32 (!%p2988_p7), 1, %s2132_s25   ;;  %p2989_p0 = scmp.ne.s32.totalorder (!%p2988_p7), %s2969_s10, 0 }
  0xaa   : > { %284 = sbr.rel (%p2988_p7) target bundleno = 991 (0x3df), region = 40  ;;  %s1403_s21 = sshll.u32 (!%p2988_p7), %s286_s0, 7 }
  0xab   : > { %s287_s9 = scalar_lea.sflag (!%p2988_p7), [#allocation4], %s286_s0  ;;  %s2510_s16 = scalar_lea.vmem (!%p2988_p7), [#allocation3], %s1403_s21 }
  0xb1   : > { %2083 = dma.done.wait (%p2989_p0), %s287_s9, 2048  }
  0xb2   : > { %2085 = vsyncadd (%p2989_p0), %s287_s9, 4294965248  ;;  %s2990_s13 = sld [smem:[#allocation21_spill]]  ;;  %s2991_s27 = sld [smem:[#allocation22_spill]] }
  0xb3   : > { %s297_s24 = sand.u32 1, %s2120_s22  }
  0xb4   : > { %s1404_s19 = sshll.u32 %s297_s24, 7 }
  0xb5   : > { %s2518_s7 = scalar_lea.vmem [#allocation6], %s1404_s19 }
  0xb8   : > { %s295_s11 = sand.u32 1, %s2990_s13   ;;  %p2992_p1 = scmp.ne.s32.totalorder %s2991_s27, 0 }
  0xb9   : > { %s296_s14 = scalar_lea.sflag [#allocation7], %s295_s11 }
  0xba   : > { %2087 = dma.done.wait (%p2992_p1), %s296_s14, 2048  }
  0xbb   : > { %2089 = vsyncadd (%p2992_p1), %s296_s14, 4294965248  ;;  %p2993_p11 = scmp.eq.s32.totalorder %s2990_s13, 0 }
  0xbd   : > { %2091 = dma.done.wait (%p2993_p11), [#allocation7], 2048   ;;  %p2994_p9 = pmov %p2993_p11 }
  0xbf   : > { %2093 = vsyncadd (%p2994_p9), [#allocation7], 4294965248  ;;  %p2995_p2 = pmov %p2994_p9 }
  0xc1   : > { %2095 = dma.done.wait (%p2995_p2), [#allocation10], 2048   ;;  %p2996_p13 = pmov %p2995_p2 }
  0xc2   : > { %s2997_s10 = sld [smem:[#allocation18_spill]]  ;;  %s2998_s8 = sld [smem:[#allocation19_spill]] }
  0xc3   : > { %2097 = vsyncadd (%p2996_p13), [#allocation10], 4294965248  ;;  %s2999_s0 = sld [smem:[#allocation20_spill]] }
  0xc8   : > { %s336_s18 = sand.u32 1, %s2997_s10   ;;  %s1408_s12 = sshll.u32 %s2998_s8, 7 }
  0xc9   : > { %s1407_s5 = sshll.u32 %s336_s18, 7  ;;  %p1409_p12 = scmp.ne.s32.totalorder %s2999_s0, 0 }
  0xca   : > { %s2536_s15 = scalar_lea.vmem [#allocation11], %s1407_s5  ;;  %v352_v0 = vld [vmem:[%s2518_s7] sm:$0xff] (!%p1409_p12)  ;;  %v353_v1 = vld [vmem:[%s2518_s7 + $0x8] sm:$0xff] (!%p1409_p12)  ;;  %v354_v2 = vld [vmem:[%s2518_s7 + $0x10] sm:$0xff] (!%p1409_p12)  ;;  %s392_s9 = sshra.s32 (!%p1409_p12), %s1408_s12, 4 }
  0xcb   : > { %351 = sbr.rel (%p1409_p12) target bundleno = 215 (0xd7), region = 60  ;;  %368 = vst [vmem:[%s2536_s15] sm:$0xff] (!%p1409_p12), %v352_v0  ;;  %369 = vst [vmem:[%s2536_s15 + $0x8] sm:$0xff] (!%p1409_p12), %v353_v1  ;;  %v355_v3 = vld [vmem:[%s2518_s7 + $0x18] sm:$0xff] (!%p1409_p12)  ;;  %v356_v4 = vld [vmem:[%s2518_s7 + $0x20] sm:$0xff] (!%p1409_p12)  ;;  %v384_v6 = vpack.c.bf16 (!%p1409_p12), %v353_v1, %v352_v0  ;;  %s1410_s13 = sshll.u32 (!%p1409_p12), %s392_s9, 3 }
  0xcc   : > { %370 = vst [vmem:[%s2536_s15 + $0x10] sm:$0xff] (!%p1409_p12), %v354_v2  ;;  %v357_v5 = vld [vmem:[%s2518_s7 + $0x28] sm:$0xff] (!%p1409_p12)  ;;  %371 = vst [vmem:[%s2536_s15 + $0x18] sm:$0xff] (!%p1409_p12), %v355_v3  ;;  %v358_v7 = vld [vmem:[%s2518_s7 + $0x30] sm:$0xff] (!%p1409_p12)  ;;  %v385_v10 = vpack.c.bf16 (!%p1409_p12), %v355_v3, %v354_v2  ;;  %s395_s27 = scalar_lea.vmem (!%p1409_p12), [#allocation2], %s1410_s13 }
  0xcd   : > { %372 = vst [vmem:[%s2536_s15 + $0x20] sm:$0xff] (!%p1409_p12), %v356_v4  ;;  %373 = vst [vmem:[%s2536_s15 + $0x28] sm:$0xff] (!%p1409_p12), %v357_v5  ;;  %v359_v8 = vld [vmem:[%s2518_s7 + $0x38] sm:$0xff] (!%p1409_p12)  ;;  %v360_v9 = vld [vmem:[%s2518_s7 + $0x40] sm:$0xff] (!%p1409_p12)  ;;  %v386_v11 = vpack.c.bf16 (!%p1409_p12), %v357_v5, %v356_v4 }
  0xce   : > { %374 = vst [vmem:[%s2536_s15 + $0x30] sm:$0xff] (!%p1409_p12), %v358_v7  ;;  %375 = vst [vmem:[%s2536_s15 + $0x38] sm:$0xff] (!%p1409_p12), %v359_v8  ;;  %v361_v12 = vld [vmem:[%s2518_s7 + $0x48] sm:$0xff] (!%p1409_p12)  ;;  %v362_v13 = vld [vmem:[%s2518_s7 + $0x50] sm:$0xff] (!%p1409_p12)  ;;  %v387_v15 = vpack.c.bf16 (!%p1409_p12), %v359_v8, %v358_v7 }
  0xcf   : > { %376 = vst [vmem:[%s2536_s15 + $0x40] sm:$0xff] (!%p1409_p12), %v360_v9  ;;  %v363_v14 = vld [vmem:[%s2518_s7 + $0x58] sm:$0xff] (!%p1409_p12)  ;;  %396 = vst [vmem:[%s395_s27] sm:$0xff] (!%p1409_p12), %v384_v6  ;;  %v364_v16 = vld [vmem:[%s2518_s7 + $0x60] sm:$0xff] (!%p1409_p12)  ;;  %v388_v19 = vpack.c.bf16 (!%p1409_p12), %v361_v12, %v360_v9 }
  0xd0   : > { %377 = vst [vmem:[%s2536_s15 + $0x48] sm:$0xff] (!%p1409_p12), %v361_v12  ;;  %378 = vst [vmem:[%s2536_s15 + $0x50] sm:$0xff] (!%p1409_p12), %v362_v13  ;;  %v365_v17 = vld [vmem:[%s2518_s7 + $0x68] sm:$0xff] (!%p1409_p12)  ;;  %v366_v18 = vld [vmem:[%s2518_s7 + $0x70] sm:$0xff] (!%p1409_p12)  ;;  %v389_v20 = vpack.c.bf16 (!%p1409_p12), %v363_v14, %v362_v13 }
  0xd1   : > { %379 = vst [vmem:[%s2536_s15 + $0x58] sm:$0xff] (!%p1409_p12), %v363_v14  ;;  %397 = vst [vmem:[%s395_s27 + $0x8] sm:$0xff] (!%p1409_p12), %v385_v10  ;;  %v367_v21 = vld [vmem:[%s2518_s7 + $0x78] sm:$0xff] (!%p1409_p12)  ;;  %v390_v22 = vpack.c.bf16 (!%p1409_p12), %v365_v17, %v364_v16 }
  0xd2   : > { %398 = vst [vmem:[%s395_s27 + $0x10] sm:$0xff] %v386_v11  ;;  %380 = vst [vmem:[%s2536_s15 + $0x60] sm:$0xff] %v364_v16  ;;  %v391_v23 = vpack.c.bf16 %v367_v21, %v366_v18 }
  0xd3   : > { %381 = vst [vmem:[%s2536_s15 + $0x68] sm:$0xff] %v365_v17  ;;  %382 = vst [vmem:[%s2536_s15 + $0x70] sm:$0xff] %v366_v18 }
  0xd4   : > { %399 = vst [vmem:[%s395_s27 + $0x18] sm:$0xff] %v387_v15  ;;  %383 = vst [vmem:[%s2536_s15 + $0x78] sm:$0xff] %v367_v21 }
  0xd5   : > { %400 = vst [vmem:[%s395_s27 + $0x20] sm:$0xff] %v388_v19  ;;  %401 = vst [vmem:[%s395_s27 + $0x28] sm:$0xff] %v389_v20 }
  0xd6   : > { %402 = vst [vmem:[%s395_s27 + $0x30] sm:$0xff] %v390_v22  ;;  %403 = vst [vmem:[%s395_s27 + $0x38] sm:$0xff] %v391_v23 }
  0xd7 PF: > { %s3001_s11 = sld [smem:[#allocation20_spill]] }
  0xdd   : > { %p1411_p6 = scmp.le.s32.totalorder %s3001_s11, 0 }
  0xde   : > { %s3002_s24 = sld [smem:[#allocation20_spill]] (!%p1411_p6)  ;;  %v1812_v24 = vld [vmem:[%s2510_s16 + $0x4] ss:$8 sps:$4 sm:$0xff] (!%p1411_p6)   ;;  %v1810_v45 = vld [vmem:[%s2510_s16] ss:$8 sps:$4 sm:$0xff] (!%p1411_p6)  }
  0xdf   : > { %407 = sbr.rel (%p1411_p6) target bundleno = 961 (0x3c1), region = 64  ;;  %571 = vmatprep.mubr.bf16.mxu0 (!%p1411_p6), %v1812_v24  ;;  %v1813_v46 = vld [vmem:[%s2510_s16 + $0x14] ss:$8 sps:$4 sm:$0xff] (!%p1411_p6)   ;;  %v1815_v47 = vld [vmem:[%s2510_s16 + $0x10] ss:$8 sps:$4 sm:$0xff] (!%p1411_p6)  }
  0xe0   : > { %v1816_v48 = vld [vmem:[%s2510_s16 + $0x24] ss:$8 sps:$4 sm:$0xff] (!%p1411_p6)   ;;  %v1818_v49 = vld [vmem:[%s2510_s16 + $0x20] ss:$8 sps:$4 sm:$0xff] (!%p1411_p6)   ;;  %v1819_v50 = vld [vmem:[%s2510_s16 + $0x34] ss:$8 sps:$4 sm:$0xff] (!%p1411_p6)  }
  0xe1   : > { %v1821_v51 = vld [vmem:[%s2510_s16 + $0x30] ss:$8 sps:$4 sm:$0xff] (!%p1411_p6)   ;;  %v1822_v52 = vld [vmem:[%s2510_s16 + $0x44] ss:$8 sps:$4 sm:$0xff] (!%p1411_p6)   ;;  %v1824_v53 = vld [vmem:[%s2510_s16 + $0x40] ss:$8 sps:$4 sm:$0xff] (!%p1411_p6)  }
  0xe2   : > { %v1825_v54 = vld [vmem:[%s2510_s16 + $0x54] ss:$8 sps:$4 sm:$0xff] (!%p1411_p6)   ;;  %v1827_v55 = vld [vmem:[%s2510_s16 + $0x50] ss:$8 sps:$4 sm:$0xff] (!%p1411_p6)   ;;  %v1828_v56 = vld [vmem:[%s2510_s16 + $0x64] ss:$8 sps:$4 sm:$0xff] (!%p1411_p6)  }
  0xe3   : > { %v1830_v57 = vld [vmem:[%s2510_s16 + $0x60] ss:$8 sps:$4 sm:$0xff] (!%p1411_p6)   ;;  %v1831_v58 = vld [vmem:[%s2510_s16 + $0x74] ss:$8 sps:$4 sm:$0xff] (!%p1411_p6)   ;;  %v1833_v59 = vld [vmem:[%s2510_s16 + $0x70] ss:$8 sps:$4 sm:$0xff] (!%p1411_p6)  }
  0xe4   : > { %s1412_s19 = sadd.s32 (!%p1411_p6), 4294967295, %s3002_s24  ;;  %s2632_s16 = sshra.s32 (!%p1411_p6), %s1408_s12, 4 }
  0xe5   : > { %p409_p8 = scmp.gt.s32.totalorder (!%p1411_p6), %s1412_s19, 0 }
  0xe7   : > { %s3036_s19 = smov (!%p409_p8, %s1412_s19), 0 }
  0xe8   : > { %s2579_s14 = sand.u32 1, %s3036_s19   ;;  %s1472_s7 = sshll.u32 %s3036_s19, 6 }
  0xe9   : > { %s1471_s10 = sshll.u32 %s2579_s14, 7  ;;  %s2583_s8 = scalar_lea.vmem [#allocation9], %s1472_s7 }
  0xea   : > { %v1834_v25 = vld [vmem:[%s2583_s8] sm:$0xff]   ;;  %s2586_s5 = scalar_lea.vmem [#allocation2], %s1471_s10  ;;  %v1835_v33 = vld [vmem:[%s2583_s8 + $0x8] sm:$0xff]   ;;  %v1836_v34 = vld [vmem:[%s2583_s8 + $0x10] sm:$0xff]   ;;  %s2600_s0 = scalar_lea.vmem [#allocation8], %s1472_s7 }
  0xeb   : > { %v451_v26 = vld [vmem:[%s2586_s5 + $0x40] sm:$0xff]  ;;  %v452_v28 = vld [vmem:[%s2586_s5 + $0x48] sm:$0xff]  ;;  %1570 = vmatprep.subr.bf16.mxu1 %v1834_v25  ;;  %v453_v30 = vld [vmem:[%s2586_s5 + $0x50] sm:$0xff]  ;;  %s1421_s9 = sshll.u32 %s2579_s14, 4  ;;  %s423_s12 = ssub.s32 1, %s2579_s14 }
  0xec   : > { %v443_v27 = vld [vmem:[%s2586_s5] sm:$0xff]  ;;  %1474 = vmatprep.subr.bf16.mxu0 %v451_v26  ;;  %1571 = vmatpush3.bf16.msra.mxu1 %v1834_v25  ;;  %v444_v29 = vld [vmem:[%s2586_s5 + $0x8] sm:$0xff]  ;;  %v445_v31 = vld [vmem:[%s2586_s5 + $0x10] sm:$0xff]  ;;  %s638_s13 = sadd.s32 %s1421_s9, %s2632_s16  ;;  %s3004_s10 = sld [smem:[#allocation28_spill]] }
  0xed   : > { %1475 = vmatpush3.bf16.msra.mxu0 %v443_v27  ;;  %v454_v32 = vld [vmem:[%s2586_s5 + $0x58] sm:$0xff]  ;;  %1572 = vmatprep.subr.bf16.mxu1 %v1835_v33  ;;  %v455_v37 = vld [vmem:[%s2586_s5 + $0x60] sm:$0xff]  ;;  %v456_v39 = vld [vmem:[%s2586_s5 + $0x68] sm:$0xff]  ;;  %s1439_s27 = sshll.u32 %s638_s13, 3 }
  0xee   : > { %1476 = vmatprep.subr.bf16.mxu0 %v452_v28  ;;  %v1837_v35 = vld [vmem:[%s2583_s8 + $0x18] sm:$0xff]   ;;  %v447_v38 = vld [vmem:[%s2586_s5 + $0x20] sm:$0xff]  ;;  %v448_v40 = vld [vmem:[%s2586_s5 + $0x28] sm:$0xff]  ;;  %s2635_s11 = scalar_lea.vmem [#allocation2], %s1439_s27 }
  0xef   : > { %v446_v36 = vld [vmem:[%s2586_s5 + $0x18] sm:$0xff]  ;;  %v457_v41 = vld [vmem:[%s2586_s5 + $0x70] sm:$0xff]  ;;  %v1838_v60 = vld [vmem:[%s2583_s8 + $0x20] sm:$0xff]  }
  0xf0   : > { %1573 = vmatpush3.bf16.msra.mxu1 %v1835_v33  ;;  %v449_v42 = vld [vmem:[%s2586_s5 + $0x30] sm:$0xff]  ;;  %v458_v43 = vld [vmem:[%s2586_s5 + $0x78] sm:$0xff]  ;;  %v1839_v61 = vld [vmem:[%s2583_s8 + $0x28] sm:$0xff]  }
  0xf1   : > { %1477 = vmatpush3.bf16.msra.mxu0 %v444_v29  ;;  %1574 = vmatprep.subr.bf16.mxu1 %v1836_v34  ;;  %v450_v44 = vld [vmem:[%s2586_s5 + $0x38] sm:$0xff]  ;;  %v1840_v62 = vld [vmem:[%s2583_s8 + $0x30] sm:$0xff]   ;;  %v1842_v0 = vld [vmem:[%s2600_s0] sm:$0xff]   ;;  %s1460_s5 = sshll.u32 %s423_s12, 4 }
  0xf2   : > { %1478 = vmatprep.subr.bf16.mxu0 %v453_v30  ;;  %v1841_v63 = vld [vmem:[%s2583_s8 + $0x38] sm:$0xff]   ;;  %v641_v1 = vld [vmem:[%s2635_s11] sm:$0xff]  ;;  %v642_v13 = vld [vmem:[%s2635_s11 + $0x8] sm:$0xff]  ;;  %s1024_s8 = scalar_lea.vmem %s3004_s10, %s3036_s19 }
  0xf3   : > { %v649_v6 = vunpack.c.l.bf16 %v641_v1  ;;  %v650_v7 = vunpack.c.h.bf16 %v641_v1  ;;  %v651_v18 = vunpack.c.l.bf16 %v642_v13  ;;  %v652_v20 = vunpack.c.h.bf16 %v642_v13  ;;  %v643_v26 = vld [vmem:[%s2635_s11 + $0x10] sm:$0xff]  ;;  %v1843_v29 = vld [vmem:[%s2600_s0 + $0x8] sm:$0xff]   ;;  %v1849_v13 = vld [vmem:[%s2600_s0 + $0x38] sm:$0xff]  }
  0xf4   : > { %1575 = vmatpush3.bf16.msra.mxu1 %v1836_v34  ;;  %v654_v34 = vunpack.c.h.bf16 %v643_v26 }
  0xf5   : > { %1479 = vmatpush3.bf16.msra.mxu0 %v445_v31  ;;  %1576 = vmatprep.subr.bf16.mxu1 %v1837_v35 }
  0xf6   : > { %1480 = vmatprep.subr.bf16.mxu0 %v454_v32  ;;  %v653_v32 = vunpack.c.l.bf16 %v643_v26 }
  0xf8   : > { %1577 = vmatpush3.bf16.msra.mxu1 %v1837_v35 }
  0xf9   : > { %1481 = vmatpush3.bf16.msra.mxu0 %v446_v36  ;;  %1578 = vmatprep.subr.bf16.mxu1 %v1838_v60 }
  0xfa   : > { %1482 = vmatprep.subr.bf16.mxu0 %v455_v37  ;;  %v1844_v37 = vld [vmem:[%s2600_s0 + $0x10] sm:$0xff]  }
  0xfc   : > { %1579 = vmatpush3.bf16.msra.mxu1 %v1838_v60 }
  0xfd   : > { %1483 = vmatpush3.bf16.msra.mxu0 %v447_v38  ;;  %1580 = vmatprep.subr.bf16.mxu1 %v1839_v61 }
  0xfe   : > { %1484 = vmatprep.subr.bf16.mxu0 %v456_v39 }
 0x100   : > { %1581 = vmatpush3.bf16.msra.mxu1 %v1839_v61 }
 0x101   : > { %1485 = vmatpush3.bf16.msra.mxu0 %v448_v40  ;;  %1582 = vmatprep.subr.bf16.mxu1 %v1840_v62 }
 0x102   : > { %1486 = vmatprep.subr.bf16.mxu0 %v457_v41  ;;  %v644_v41 = vld [vmem:[%s2635_s11 + $0x18] sm:$0xff] }
 0x104   : > { %1583 = vmatpush3.bf16.msra.mxu1 %v1840_v62 }
 0x105   : > { %1487 = vmatpush3.bf16.msra.mxu0 %v449_v42  ;;  %1584 = vmatprep.subr.bf16.mxu1 %v1841_v63 }
 0x106   : > { %1488 = vmatprep.subr.bf16.mxu0 %v458_v43 }
 0x108   : > { %1585 = vmatpush3.bf16.msra.mxu1 %v1841_v63 }
 0x109   : > { %1489 = vmatpush3.bf16.msra.mxu0 %v450_v44  ;;  %1602 = vmatprep.subr.bf16.mxu1 %v1842_v0  ;;  %v1845_v44 = vld [vmem:[%s2600_s0 + $0x18] sm:$0xff]  }
 0x10c   : > { %572 = vmatmul.mubr.bf16.vlgmr.msra.gmra.mrb[0].mxu0 %v1810_v45 }
 0x10d   : > { %579 = vmatprep.mubr.bf16.mxu0 %v1813_v46 }
 0x114   : > { %580 = vmatmul.mubr.bf16.gmra.mrb[4].mxu0 %v1815_v47  ;;  %v655_v47 = vunpack.c.l.bf16 %v644_v41 }
 0x115   : > { %587 = vmatprep.mubr.bf16.mxu0 %v1816_v48 }
 0x11c   : > { %588 = vmatmul.mubr.bf16.gmra.mrb[8].mxu0 %v1818_v49  ;;  %v656_v49 = vunpack.c.h.bf16 %v644_v41 }
 0x11d   : > { %595 = vmatprep.mubr.bf16.mxu0 %v1819_v50 }
 0x124   : > { %596 = vmatmul.mubr.bf16.gmra.mrb[12].mxu0 %v1821_v51 }
 0x125   : > { %603 = vmatprep.mubr.bf16.mxu0 %v1822_v52  ;;  %v1846_v52 = vld [vmem:[%s2600_s0 + $0x20] sm:$0xff]  }
 0x12c   : > { %604 = vmatmul.mubr.bf16.gmra.mrb[16].mxu0 %v1824_v53 }
 0x12d   : > { %611 = vmatprep.mubr.bf16.mxu0 %v1825_v54 }
 0x134   : > { %612 = vmatmul.mubr.bf16.gmra.mrb[20].mxu0 %v1827_v55 }
 0x135   : > { %619 = vmatprep.mubr.bf16.mxu0 %v1828_v56  ;;  %v645_v56 = vld [vmem:[%s2635_s11 + $0x20] sm:$0xff] }
 0x136   : > { %v657_v62 = vunpack.c.l.bf16 %v645_v56 }
 0x13c   : > { %620 = vmatmul.mubr.bf16.gmra.mrb[24].mxu0 %v1830_v57 }
 0x13d   : > { %627 = vmatprep.mubr.bf16.mxu0 %v1831_v58 }
 0x144   : > { %628 = vmatmul.mubr.bf16.gmra.mrb[28].mxu0 %v1833_v59  ;;  %v1847_v59 = vld [vmem:[%s2600_s0 + $0x28] sm:$0xff]  }
 0x1df   : > { %v1490_v2 = vpop.f32.mrb[0].mxu0 }
 0x1e0   : > { %v1491_v3 = vpop.f32.mrb[1].mxu0 }
 0x1e1   : > { %v2638_v4 = vadd.f32 %v1491_v3, %v1490_v2  ;;  %v1493_v5 = vpop.f32.mrb[2].mxu0  ;;  %v1848_v3 = vld [vmem:[%s2600_s0 + $0x30] sm:$0xff]   ;;  %s1105_s0 = sadd.s32 %s1460_s5, %s2632_s16 }
 0x1e2   : > { %v1494_v8 = vpop.f32.mrb[3].mxu0  ;;  %s1461_s14 = sshll.u32 %s1105_s0, 3 }
 0x1e3   : > { %v2640_v9 = vadd.f32 %v1494_v8, %v1493_v5  ;;  %v665_v11 = vmul.f32 %v2638_v4, %v649_v6  ;;  %v646_v8 = vld [vmem:[%s2635_s11 + $0x28] sm:$0xff]  ;;  %s2732_s19 = scalar_lea.vmem [#allocation2], %s1461_s14 }
 0x1e5   : > { %v681_v10 = vpack.c.bf16 %v2640_v9, %v2638_v4  ;;  %v666_v12 = vmul.f32 %v2640_v9, %v650_v7  ;;  %v2705_v4 = vld [vmem:[%s1024_s8] ss:$0 sm:$0xff] }
 0x1e7   : > { %v1496_v14 = vpop.f32.mrb[4].mxu0  ;;  %v708_v15 = vpack.c.bf16 %v666_v12, %v665_v11 }
 0x1e8   : > { %v1497_v16 = vpop.f32.mrb[5].mxu0 }
 0x1e9   : > { %v2647_v17 = vadd.f32 %v1497_v16, %v1496_v14  ;;  %v1499_v19 = vpop.f32.mrb[6].mxu0  ;;  %1586 = vmatprep.mubr.bf16.mxu1 %v708_v15  ;;  %v659_v16 = vunpack.c.l.bf16 %v646_v8 }
 0x1ea   : > { %v1500_v21 = vpop.f32.mrb[7].mxu0 }
 0x1eb   : > { %v2649_v22 = vadd.f32 %v1500_v21, %v1499_v19  ;;  %v667_v23 = vmul.f32 %v2647_v17, %v651_v18  ;;  %v660_v19 = vunpack.c.h.bf16 %v646_v8 }
 0x1ed   : > { %v668_v24 = vmul.f32 %v2649_v22, %v652_v20  ;;  %v682_v25 = vpack.c.bf16 %v2649_v22, %v2647_v17 }
 0x1ef   : > { %v1502_v27 = vpop.f32.mrb[8].mxu0  ;;  %v709_v28 = vpack.c.bf16 %v668_v24, %v667_v23 }
 0x1f0   : > { %v1503_v30 = vpop.f32.mrb[9].mxu0 }
 0x1f1   : > { %v2657_v31 = vadd.f32 %v1503_v30, %v1502_v27  ;;  %v1505_v33 = vpop.f32.mrb[10].mxu0  ;;  %1587 = vmatmul.mubr.bf16.vlgmr.msra.gmra.mrb[0].mxu1 %v709_v28  ;;  %v647_v27 = vld [vmem:[%s2635_s11 + $0x30] sm:$0xff] }
 0x1f2   : > { %v1506_v35 = vpop.f32.mrb[11].mxu0  ;;  %1603 = vmatpush3.bf16.msra.mxu1 %v1842_v0  ;;  %v658_v0 = vunpack.c.h.bf16 %v645_v56 }
 0x1f3   : > { %v2659_v36 = vadd.f32 %v1506_v35, %v1505_v33  ;;  %1604 = vmatprep.subr.bf16.mxu1 %v1843_v29  ;;  %v669_v38 = vmul.f32 %v2657_v31, %v653_v32  ;;  %v661_v33 = vunpack.c.l.bf16 %v647_v27  ;;  %v662_v35 = vunpack.c.h.bf16 %v647_v27 }
 0x1f5   : > { %v670_v39 = vmul.f32 %v2659_v36, %v654_v34  ;;  %v683_v40 = vpack.c.bf16 %v2659_v36, %v2657_v31 }
 0x1f6   : > { %1605 = vmatpush3.bf16.msra.mxu1 %v1843_v29 }
 0x1f7   : > { %v1508_v42 = vpop.f32.mrb[12].mxu0  ;;  %v710_v43 = vpack.c.bf16 %v670_v39, %v669_v38  ;;  %1606 = vmatprep.subr.bf16.mxu1 %v1844_v37 }
 0x1f8   : > { %v1509_v45 = vpop.f32.mrb[13].mxu0 }
 0x1f9   : > { %v2668_v46 = vadd.f32 %v1509_v45, %v1508_v42  ;;  %v1511_v48 = vpop.f32.mrb[14].mxu0  ;;  %1590 = vmatprep.mubr.bf16.mxu1 %v710_v43  ;;  %v648_v43 = vld [vmem:[%s2635_s11 + $0x38] sm:$0xff] }
 0x1fa   : > { %v1512_v50 = vpop.f32.mrb[15].mxu0  ;;  %1607 = vmatpush3.bf16.msra.mxu1 %v1844_v37 }
 0x1fb   : > { %v2670_v51 = vadd.f32 %v1512_v50, %v1511_v48  ;;  %1608 = vmatprep.subr.bf16.mxu1 %v1845_v44  ;;  %v671_v53 = vmul.f32 %v2668_v46, %v655_v47 }
 0x1fd   : > { %v672_v54 = vmul.f32 %v2670_v51, %v656_v49  ;;  %v684_v55 = vpack.c.bf16 %v2670_v51, %v2668_v46  ;;  %v663_v49 = vunpack.c.l.bf16 %v648_v43 }
 0x1fe   : > { %1609 = vmatpush3.bf16.msra.mxu1 %v1845_v44 }
 0x1ff   : > { %v1514_v57 = vpop.f32.mrb[16].mxu0  ;;  %v711_v58 = vpack.c.bf16 %v672_v54, %v671_v53  ;;  %1610 = vmatprep.subr.bf16.mxu1 %v1846_v52 }
 0x200   : > { %v1515_v60 = vpop.f32.mrb[17].mxu0 }
 0x201   : > { %v2679_v61 = vadd.f32 %v1515_v60, %v1514_v57  ;;  %v1517_v63 = vpop.f32.mrb[18].mxu0  ;;  %1591 = vmatmul.mubr.bf16.gmra.mrb[4].mxu1 %v711_v58 }
 0x202   : > { %v1518_v1 = vpop.f32.mrb[19].mxu0  ;;  %1611 = vmatpush3.bf16.msra.mxu1 %v1846_v52  ;;  %v664_v52 = vunpack.c.h.bf16 %v648_v43 }
 0x203   : > { %v1519_v2 = vadd.f32 %v1518_v1, %v1517_v63  ;;  %1612 = vmatprep.subr.bf16.mxu1 %v1847_v59  ;;  %v673_v5 = vmul.f32 %v2679_v61, %v657_v62 }
 0x205   : > { %v674_v6 = vmul.f32 %v1519_v2, %v658_v0  ;;  %v685_v7 = vpack.c.bf16 %v1519_v2, %v2679_v61 }
 0x206   : > { %1613 = vmatpush3.bf16.msra.mxu1 %v1847_v59 }
 0x207   : > { %v1520_v11 = vpop.f32.mrb[20].mxu0  ;;  %v712_v12 = vpack.c.bf16 %v674_v6, %v673_v5  ;;  %1614 = vmatprep.subr.bf16.mxu1 %v1848_v3 }
 0x208   : > { %v1521_v14 = vpop.f32.mrb[21].mxu0 }
 0x209   : > { %v1522_v15 = vadd.f32 %v1521_v14, %v1520_v11  ;;  %v1523_v18 = vpop.f32.mrb[22].mxu0  ;;  %1594 = vmatprep.mubr.bf16.mxu1 %v712_v12 }
 0x20a   : > { %v1524_v20 = vpop.f32.mrb[23].mxu0  ;;  %1615 = vmatpush3.bf16.msra.mxu1 %v1848_v3 }
 0x20b   : > { %v1525_v21 = vadd.f32 %v1524_v20, %v1523_v18  ;;  %1616 = vmatprep.subr.bf16.mxu1 %v1849_v13  ;;  %v675_v23 = vmul.f32 %v1522_v15, %v659_v16 }
 0x20d   : > { %v676_v24 = vmul.f32 %v1525_v21, %v660_v19  ;;  %v686_v26 = vpack.c.bf16 %v1525_v21, %v1522_v15 }
 0x20e   : > { %1617 = vmatpush3.bf16.msra.mxu1 %v1849_v13 }
 0x20f   : > { %v1526_v28 = vpop.f32.mrb[24].mxu0  ;;  %v713_v29 = vpack.c.bf16 %v676_v24, %v675_v23 }
 0x210   : > { %v1527_v30 = vpop.f32.mrb[25].mxu0 }
 0x211   : > { %v1528_v32 = vadd.f32 %v1527_v30, %v1526_v28  ;;  %v1529_v34 = vpop.f32.mrb[26].mxu0  ;;  %1595 = vmatmul.mubr.bf16.gmra.mrb[8].mxu1 %v713_v29 }
 0x212   : > { %v1530_v37 = vpop.f32.mrb[27].mxu0 }
 0x213   : > { %v1531_v38 = vadd.f32 %v1530_v37, %v1529_v34  ;;  %v677_v39 = vmul.f32 %v1528_v32, %v661_v33 }
 0x215   : > { %v678_v41 = vmul.f32 %v1531_v38, %v662_v35  ;;  %v687_v42 = vpack.c.bf16 %v1531_v38, %v1528_v32 }
 0x217   : > { %v1532_v44 = vpop.f32.mrb[28].mxu0  ;;  %v714_v45 = vpack.c.bf16 %v678_v41, %v677_v39 }
 0x218   : > { %v1533_v47 = vpop.f32.mrb[29].mxu0 }
 0x219   : > { %v1534_v48 = vadd.f32 %v1533_v47, %v1532_v44  ;;  %v1535_v50 = vpop.f32.mrb[30].mxu0  ;;  %1598 = vmatprep.mubr.bf16.mxu1 %v714_v45 }
 0x21a   : > { %v1536_v53 = vpop.f32.mrb[31].mxu0 }
 0x21b   : > { %v1537_v54 = vadd.f32 %v1536_v53, %v1535_v50  ;;  %v679_v56 = vmul.f32 %v1534_v48, %v663_v49 }
 0x21d   : > { %v680_v57 = vmul.f32 %v1537_v54, %v664_v52  ;;  %v688_v58 = vpack.c.bf16 %v1537_v54, %v1534_v48 }
 0x21f   : > { %v715_v59 = vpack.c.bf16 %v680_v57, %v679_v56 }
 0x221   : > { %1599 = vmatmul.mubr.bf16.gmra.mrb[12].mxu1 %v715_v59 }
 0x222   : > { %1618 = vmatprep.mubr.bf16.mxu1 %v681_v10 }
 0x229   : > { %1619 = vmatmul.mubr.bf16.vlgmr.msra.gmra.mrb[0].mxu1 %v682_v25 }
 0x22a   : > { %1622 = vmatprep.mubr.bf16.mxu1 %v683_v40 }
 0x231   : > { %1623 = vmatmul.mubr.bf16.gmra.mrb[4].mxu1 %v684_v55 }
 0x232   : > { %1626 = vmatprep.mubr.bf16.mxu1 %v685_v7 }
 0x239   : > { %1627 = vmatmul.mubr.bf16.gmra.mrb[8].mxu1 %v686_v26 }
 0x23a   : > { %1630 = vmatprep.mubr.bf16.mxu1 %v687_v42 }
 0x241   : > { %1631 = vmatmul.mubr.bf16.gmra.mrb[12].mxu1 %v688_v58 }
 0x2fc   : > { %v1620_v9 = vpop.f32.mrb[0].mxu1 }
 0x2fd   : > { %v1034_v10 = vadd.f32 %v1620_v9, %v2705_v4  ;;  %v961_v17 = vpop.f32.mrb[1].mxu1 }
 0x2fe   : > { %v1032_v22 = vadd.f32 %v2705_v4, %v961_v17  ;;  %v1621_v25 = vpop.f32.mrb[2].mxu1 }
 0x2ff   : > { %v1066_v31 = vmul.f32 0.2, %v1034_v10  ;;  %v1035_v36 = vadd.f32 %v1621_v25, %v2705_v4  ;;  %v964_v40 = vpop.f32.mrb[3].mxu1  ;;  %vm1050_vm0 = vcmp.gt.f32.partialorder %v1034_v10, 0.0 }
 0x300   : > { %v1064_v46 = vmul.f32 0.2, %v1032_v22  ;;  %v1033_v51 = vadd.f32 %v2705_v4, %v964_v40  ;;  %vm1048_vm1 = vcmp.gt.f32.partialorder %v1032_v22, 0.0 }
 0x301   : > { %vm1051_vm2 = vcmp.gt.f32.partialorder %v1035_v36, 0.0  ;;  %v1067_v55 = vmul.f32 0.2, %v1035_v36  ;;  %v2712_v60 = vsel %vm1050_vm0, %v1034_v10, %v1066_v31 }
 0x302   : > { %vm1049_vm3 = vcmp.gt.f32.partialorder %v1033_v51, 0.0  ;;  %v1065_v61 = vmul.f32 0.2, %v1033_v51  ;;  %v1118_v62 = vmul.f32 %v2712_v60, %v2712_v60  ;;  %v2716_v63 = vsel %vm1048_vm1, %v1032_v22, %v1064_v46 }
 0x303   : > { %v1116_v0 = vmul.f32 %v2716_v63, %v2716_v63  ;;  %v2720_v1 = vsel %vm1051_vm2, %v1035_v36, %v1067_v55 }
 0x304   : > { %1136 = vadd.xlane.f32.xlu1 %v1118_v62  ;;  %v1624_v2 = vpop.f32.mrb[4].mxu1  ;;  %v1097_v3 = vpack.c.bf16 %v2720_v1, %v2712_v60  ;;  %v2724_v5 = vsel %vm1049_vm3, %v1033_v51, %v1065_v61  ;;  %v1119_v13 = vmul.f32 %v2720_v1, %v2720_v1 }
 0x305   : > { %v1038_v6 = vadd.f32 %v1624_v2, %v2705_v4  ;;  %1132 = vadd.xlane.f32.xlu0 %v1116_v0  ;;  %v977_v7 = vpop.f32.mrb[5].mxu1  ;;  %v1096_v8 = vpack.c.bf16 %v2724_v5, %v2716_v63  ;;  %v1117_v18 = vmul.f32 %v2724_v5, %v2724_v5 }
 0x306   : > { %v1036_v11 = vadd.f32 %v2705_v4, %v977_v7  ;;  %v1625_v12 = vpop.f32.mrb[6].mxu1  ;;  %1109 = vst [vmem:[%s2732_s19 + $0x8] sm:$0xff] %v1097_v3 }
 0x307   : > { %vm1054_vm4 = vcmp.gt.f32.partialorder %v1038_v6, 0.0  ;;  %v1070_v14 = vmul.f32 0.2, %v1038_v6  ;;  %v1039_v15 = vadd.f32 %v1625_v12, %v2705_v4  ;;  %v980_v16 = vpop.f32.mrb[7].mxu1  ;;  %1108 = vst [vmem:[%s2732_s19] sm:$0xff] %v1096_v8 }
 0x308   : > { %v1068_v19 = vmul.f32 0.2, %v1036_v11  ;;  %v1037_v20 = vadd.f32 %v2705_v4, %v980_v16  ;;  %1138 = vadd.xlane.f32.xlu1 %v1119_v13  ;;  %vm1052_vm5 = vcmp.gt.f32.partialorder %v1036_v11, 0.0 }
 0x309   : > { %vm1055_vm6 = vcmp.gt.f32.partialorder %v1039_v15, 0.0  ;;  %v1071_v21 = vmul.f32 0.2, %v1039_v15  ;;  %1134 = vadd.xlane.f32.xlu0 %v1117_v18  ;;  %v2740_v23 = vsel %vm1054_vm4, %v1038_v6, %v1070_v14 }
 0x30a   : > { %vm1053_vm7 = vcmp.gt.f32.partialorder %v1037_v20, 0.0  ;;  %v1069_v24 = vmul.f32 0.2, %v1037_v20  ;;  %v1122_v26 = vmul.f32 %v2740_v23, %v2740_v23  ;;  %v2750_v32 = vsel %vm1052_vm5, %v1036_v11, %v1068_v19 }
 0x30b   : > { %v2744_v27 = vsel %vm1055_vm6, %v1039_v15, %v1071_v21  ;;  %v1120_v44 = vmul.f32 %v2750_v32, %v2750_v32 }
 0x30c   : > { %v1628_v28 = vpop.f32.mrb[8].mxu1  ;;  %v1123_v29 = vmul.f32 %v2744_v27, %v2744_v27  ;;  %v1099_v30 = vpack.c.bf16 %v2744_v27, %v2740_v23  ;;  %v2752_v33 = vsel %vm1053_vm7, %v1037_v20, %v1069_v24 }
 0x30d   : > { %v1042_v34 = vadd.f32 %v1628_v28, %v2705_v4  ;;  %1144 = vadd.xlane.f32.xlu0 %v1122_v26  ;;  %v993_v35 = vpop.f32.mrb[9].mxu1  ;;  %v1098_v37 = vpack.c.bf16 %v2752_v33, %v2750_v32  ;;  %v1121_v48 = vmul.f32 %v2752_v33, %v2752_v33 }
 0x30e   : > { %v1040_v38 = vadd.f32 %v2705_v4, %v993_v35  ;;  %1146 = vadd.xlane.f32.xlu1 %v1123_v29  ;;  %1111 = vst [vmem:[%s2732_s19 + $0x18] sm:$0xff] %v1099_v30  ;;  %v1629_v39 = vpop.f32.mrb[10].mxu1 }
 0x30f   : > { %vm1058_vm8 = vcmp.gt.f32.partialorder %v1042_v34, 0.0  ;;  %v1074_v41 = vmul.f32 0.2, %v1042_v34  ;;  %v1043_v42 = vadd.f32 %v1629_v39, %v2705_v4  ;;  %v996_v43 = vpop.f32.mrb[11].mxu1  ;;  %1110 = vst [vmem:[%s2732_s19 + $0x10] sm:$0xff] %v1098_v37 }
 0x310   : > { %v1072_v45 = vmul.f32 0.2, %v1040_v38  ;;  %v1041_v47 = vadd.f32 %v2705_v4, %v996_v43  ;;  %vm1056_vm9 = vcmp.gt.f32.partialorder %v1040_v38, 0.0 }
 0x311   : > { %vm1059_vm10 = vcmp.gt.f32.partialorder %v1043_v42, 0.0  ;;  %v1075_v49 = vmul.f32 0.2, %v1043_v42  ;;  %1140 = vadd.xlane.f32.xlu0 %v1120_v44  ;;  %v2766_v50 = vsel %vm1058_vm8, %v1042_v34, %v1074_v41 }
 0x312   : > { %vm1057_vm11 = vcmp.gt.f32.partialorder %v1041_v47, 0.0  ;;  %v1073_v52 = vmul.f32 0.2, %v1041_v47  ;;  %1142 = vadd.xlane.f32.xlu1 %v1121_v48  ;;  %v1126_v53 = vmul.f32 %v2766_v50, %v2766_v50  ;;  %v2776_v59 = vsel %vm1056_vm9, %v1040_v38, %v1072_v45 }
 0x313   : > { %v2770_v54 = vsel %vm1059_vm10, %v1043_v42, %v1075_v49  ;;  %v1124_v51 = vmul.f32 %v2776_v59, %v2776_v59 }
 0x314   : > { %v1632_v56 = vpop.f32.mrb[12].mxu1  ;;  %v1127_v57 = vmul.f32 %v2770_v54, %v2770_v54  ;;  %v1101_v58 = vpack.c.bf16 %v2770_v54, %v2766_v50  ;;  %v2778_v9 = vsel %vm1057_vm11, %v1041_v47, %v1073_v52 }
 0x315   : > { %v1046_v10 = vadd.f32 %v1632_v56, %v2705_v4  ;;  %1152 = vadd.xlane.f32.xlu0 %v1126_v53  ;;  %v1009_v17 = vpop.f32.mrb[13].mxu1  ;;  %v1100_v22 = vpack.c.bf16 %v2778_v9, %v2776_v59  ;;  %v1125_v55 = vmul.f32 %v2778_v9, %v2778_v9 }
 0x316   : > { %v1044_v25 = vadd.f32 %v2705_v4, %v1009_v17  ;;  %1154 = vadd.xlane.f32.xlu1 %v1127_v57  ;;  %1113 = vst [vmem:[%s2732_s19 + $0x28] sm:$0xff] %v1101_v58  ;;  %v1633_v31 = vpop.f32.mrb[14].mxu1 }
 0x317   : > { %v1078_v36 = vmul.f32 0.2, %v1046_v10  ;;  %v1047_v40 = vadd.f32 %v1633_v31, %v2705_v4  ;;  %v1012_v46 = vpop.f32.mrb[15].mxu1  ;;  %1112 = vst [vmem:[%s2732_s19 + $0x20] sm:$0xff] %v1100_v22  ;;  %vm1062_vm12 = vcmp.gt.f32.partialorder %v1046_v10, 0.0 }
 0x318   : > { %vm1060_vm13 = vcmp.gt.f32.partialorder %v1044_v25, 0.0  ;;  %v1076_v61 = vmul.f32 0.2, %v1044_v25  ;;  %v1045_v62 = vadd.f32 %v2705_v4, %v1012_v46 }
 0x319   : > { %vm1063_vm14 = vcmp.gt.f32.partialorder %v1047_v40, 0.0  ;;  %v1079_v0 = vmul.f32 0.2, %v1047_v40  ;;  %1148 = vadd.xlane.f32.xlu0 %v1124_v51  ;;  %v2796_v7 = vsel %vm1062_vm12, %v1046_v10, %v1078_v36 }
 0x31a   : > { %vm1061_vm15 = vcmp.gt.f32.partialorder %v1045_v62, 0.0  ;;  %v1077_v2 = vmul.f32 0.2, %v1045_v62  ;;  %1150 = vadd.xlane.f32.xlu1 %v1125_v55  ;;  %v2792_v3 = vsel %vm1060_vm13, %v1044_v25, %v1076_v61  ;;  %v1130_v14 = vmul.f32 %v2796_v7, %v2796_v7 }
 0x31b   : > { %v1128_v6 = vmul.f32 %v2792_v3, %v2792_v3  ;;  %v2798_v8 = vsel %vm1063_vm14, %v1047_v40, %v1079_v0 }
 0x31c   : > { %v2800_v11 = vsel %vm1061_vm15, %v1045_v62, %v1077_v2  ;;  %v1103_v4 = vpack.c.bf16 %v2798_v8, %v2796_v7  ;;  %v1131_v15 = vmul.f32 %v2798_v8, %v2798_v8 }
 0x31d   : > { %1156 = vadd.xlane.f32.xlu0 %v1128_v6  ;;  %v1129_v12 = vmul.f32 %v2800_v11, %v2800_v11  ;;  %v1102_v13 = vpack.c.bf16 %v2800_v11, %v2792_v3 }
 0x31e   : > { %1115 = vst [vmem:[%s2732_s19 + $0x38] sm:$0xff] %v1103_v4 }
 0x31f   : > { %1158 = vadd.xlane.f32.xlu1 %v1129_v12  ;;  %1114 = vst [vmem:[%s2732_s19 + $0x30] sm:$0xff] %v1102_v13 }
 0x321   : > { %1160 = vadd.xlane.f32.xlu0 %v1130_v14 }
 0x323   : > { %1162 = vadd.xlane.f32.xlu1 %v1131_v15 }
 0x391   : > { %v1137_v16 = vpop.xlane.xlu1 %1136 }
 0x392   : > { %v1166_v18 = vmax.f32 %v1137_v16, 1e-24  ;;  %v1133_v19 = vpop.xlane.xlu0 %1132 }
 0x393   : > { %v1164_v20 = vmax.f32 %v1133_v19, 1e-24 }
 0x394   : > { %1850 = vrsqrt.f32 %v1166_v18 }
 0x395   : > { %1852 = vrsqrt.f32 %v1164_v20  ;;  %v1139_v21 = vpop.xlane.xlu1 %1138 }
 0x396   : > { %v1167_v24 = vmax.f32 %v1139_v21, 1e-24  ;;  %v1135_v26 = vpop.xlane.xlu0 %1134 }
 0x397   : > { %v1165_v28 = vmax.f32 %v1135_v26, 1e-24 }
 0x398   : > { %1854 = vrsqrt.f32 %v1167_v24 }
 0x399   : > { %1856 = vrsqrt.f32 %v1165_v28 }
 0x39a   : > { %v1145_v29 = vpop.xlane.xlu0 %1144 }
 0x39b   : > { %v1170_v30 = vmax.f32 %v1145_v29, 1e-24  ;;  %v1147_v34 = vpop.xlane.xlu1 %1146 }
 0x39c   : > { %v1171_v35 = vmax.f32 %v1147_v34, 1e-24 }
 0x39d   : > { %1858 = vrsqrt.f32 %v1170_v30 }
 0x39e   : > { %v1851_v37 = vpop.eup %1850  ;;  %1860 = vrsqrt.f32 %v1171_v35  ;;  %v1141_v38 = vpop.xlane.xlu0 %1140 }
 0x39f   : > { %v1853_v39 = vpop.eup %1852  ;;  %v1198_v41 = vmul.f32 %v1851_v37, %v2712_v60  ;;  %v1168_v42 = vmax.f32 %v1141_v38, 1e-24  ;;  %v1143_v43 = vpop.xlane.xlu1 %1142 }
 0x3a0   : > { %v1196_v44 = vmul.f32 %v1853_v39, %v2716_v63  ;;  %v1169_v45 = vmax.f32 %v1143_v43, 1e-24 }
 0x3a1   : > { %1214 = vst [vmem:[%s2536_s15 + $0x10] sm:$0xff] %v1198_v41  ;;  %1862 = vrsqrt.f32 %v1168_v42 }
 0x3a2   : > { %v1855_v47 = vpop.eup %1854  ;;  %1212 = vst [vmem:[%s2536_s15] sm:$0xff] %v1196_v44  ;;  %1864 = vrsqrt.f32 %v1169_v45  ;;  %v1153_v48 = vpop.xlane.xlu0 %1152 }
 0x3a3   : > { %v1857_v49 = vpop.eup %1856  ;;  %v1199_v52 = vmul.f32 %v1855_v47, %v2720_v1  ;;  %v1174_v53 = vmax.f32 %v1153_v48, 1e-24  ;;  %v1155_v56 = vpop.xlane.xlu1 %1154 }
 0x3a4   : > { %v1197_v60 = vmul.f32 %v1857_v49, %v2724_v5  ;;  %v1175_v57 = vmax.f32 %v1155_v56, 1e-24 }
 0x3a5   : > { %1215 = vst [vmem:[%s2536_s15 + $0x18] sm:$0xff] %v1199_v52  ;;  %1866 = vrsqrt.f32 %v1174_v53 }
 0x3a6   : > { %1213 = vst [vmem:[%s2536_s15 + $0x8] sm:$0xff] %v1197_v60  ;;  %1868 = vrsqrt.f32 %v1175_v57  ;;  %v1149_v63 = vpop.xlane.xlu0 %1148 }
 0x3a7   : > { %v1859_v58 = vpop.eup %1858  ;;  %v1172_v10 = vmax.f32 %v1149_v63, 1e-24  ;;  %v1151_v17 = vpop.xlane.xlu1 %1150 }
 0x3a8   : > { %v1861_v22 = vpop.eup %1860  ;;  %v1202_v25 = vmul.f32 %v1859_v58, %v2740_v23  ;;  %v1173_v1 = vmax.f32 %v1151_v17, 1e-24 }
 0x3a9   : > { %v1203_v31 = vmul.f32 %v1861_v22, %v2744_v27  ;;  %1870 = vrsqrt.f32 %v1172_v10 }
 0x3aa   : > { %1218 = vst [vmem:[%s2536_s15 + $0x30] sm:$0xff] %v1202_v25  ;;  %1872 = vrsqrt.f32 %v1173_v1  ;;  %v1157_v5 = vpop.xlane.xlu0 %1156 }
 0x3ab   : > { %v1863_v36 = vpop.eup %1862  ;;  %1219 = vst [vmem:[%s2536_s15 + $0x38] sm:$0xff] %v1203_v31  ;;  %v1176_v40 = vmax.f32 %v1157_v5, 1e-24 }
 0x3ac   : > { %v1865_v46 = vpop.eup %1864  ;;  %v1200_v51 = vmul.f32 %v1863_v36, %v2750_v32  ;;  %v1159_v55 = vpop.xlane.xlu1 %1158 }
 0x3ad   : > { %v1201_v61 = vmul.f32 %v1865_v46, %v2752_v33  ;;  %1874 = vrsqrt.f32 %v1176_v40  ;;  %v1177_v23 = vmax.f32 %v1159_v55, 1e-24 }
 0x3ae   : > { %1216 = vst [vmem:[%s2536_s15 + $0x20] sm:$0xff] %v1200_v51  ;;  %v1161_v27 = vpop.xlane.xlu0 %1160 }
 0x3af   : > { %v1867_v62 = vpop.eup %1866  ;;  %1217 = vst [vmem:[%s2536_s15 + $0x28] sm:$0xff] %v1201_v61  ;;  %1876 = vrsqrt.f32 %v1177_v23  ;;  %v1178_v0 = vmax.f32 %v1161_v27, 1e-24 }
 0x3b0   : > { %v1869_v2 = vpop.eup %1868  ;;  %v1206_v6 = vmul.f32 %v1867_v62, %v2766_v50  ;;  %v1163_v4 = vpop.xlane.xlu1 %1162 }
 0x3b1   : > { %v1207_v32 = vmul.f32 %v1869_v2, %v2770_v54  ;;  %1878 = vrsqrt.f32 %v1178_v0  ;;  %v1179_v33 = vmax.f32 %v1163_v4, 1e-24 }
 0x3b2   : > { %1222 = vst [vmem:[%s2536_s15 + $0x50] sm:$0xff] %v1206_v6 }
 0x3b3   : > { %v1871_v12 = vpop.eup %1870  ;;  %1223 = vst [vmem:[%s2536_s15 + $0x58] sm:$0xff] %v1207_v32  ;;  %1880 = vrsqrt.f32 %v1179_v33 }
 0x3b4   : > { %v1873_v13 = vpop.eup %1872  ;;  %v1204_v14 = vmul.f32 %v1871_v12, %v2776_v59 }
 0x3b5   : > { %v1205_v15 = vmul.f32 %v1873_v13, %v2778_v9 }
 0x3b6   : > { %1220 = vst [vmem:[%s2536_s15 + $0x40] sm:$0xff] %v1204_v14 }
 0x3b7   : > { %v1875_v50 = vpop.eup %1874  ;;  %1221 = vst [vmem:[%s2536_s15 + $0x48] sm:$0xff] %v1205_v15 }
 0x3b8   : > { %v1208_v16 = vmul.f32 %v1875_v50, %v2792_v3 }
 0x3b9   : > { %v1877_v54 = vpop.eup %1876 }
 0x3ba   : > { %1224 = vst [vmem:[%s2536_s15 + $0x60] sm:$0xff] %v1208_v16  ;;  %v1209_v18 = vmul.f32 %v1877_v54, %v2800_v11 }
 0x3bb   : > { %v1879_v19 = vpop.eup %1878 }
 0x3bc   : > { %1225 = vst [vmem:[%s2536_s15 + $0x68] sm:$0xff] %v1209_v18  ;;  %v1210_v20 = vmul.f32 %v1879_v19, %v2796_v7 }
 0x3bd   : > { %v1881_v21 = vpop.eup %1880 }
 0x3be   : > { %1226 = vst [vmem:[%s2536_s15 + $0x70] sm:$0xff] %v1210_v20  ;;  %v1211_v24 = vmul.f32 %v1881_v21, %v2798_v8 }
 0x3c0   : > { %1227 = vst [vmem:[%s2536_s15 + $0x78] sm:$0xff] %v1211_v24 }
 0x3c1 PF: > { %s3005_s21 = sld [smem:[#allocation19_spill]]  ;;  %s3006_s9 = sld [smem:[#allocation20_spill]] }
 0x3c2   : > { %s3008_s13 = sld [smem:[#allocation23_spill]]  ;;  %s1244_s11 = sshll.u32 %s2536_s15, 4  ;;  %s2849_s11 = int_to_ptr.vmem [resolvable:$true] %s1244_s11 }
 0x3c3   : > { %s3009_s8 = sld [smem:[#allocation29_spill]]  ;;  %s2858_s0 = scalar_lea.sflag [#allocation5], %s336_s18 }
 0x3c4   : > { %s1998_s14 = scalar_lea.vmem %s2849_s11, 2048  ;;  %s2166_s15 = smov [#allocation11]  }
 0x3c5   : > { %p1999_p4 = scmp.ne.s32.totalorder %s2849_s11, %s1998_s14  ;;  %s2002_s19 = sshll.u32 %s2166_s15, 4  ;;  %s2003_s19 = int_to_ptr.vmem [resolvable:$false] %s2002_s19 }
 0x3c6   : > { %p2005_p7 = scmp.lt.s32.totalorder %s2849_s11, %s2003_s19 }
 0x3c7   : > { %s1650_s27 = smul.u32 48, %s3005_s21  ;;  %s2004_s21 = scalar_lea.vmem %s2003_s19, 4096 }
 0x3c8   : > { %p3010_p10 = scmp.ne.s32.totalorder %s3008_s13, 0  ;;  %p2006_p0 = scmp.lt.s32.totalorder %s2004_s21, %s1998_s14 }
 0x3c9   : > { %s1241_s12 = sadd.s32 %s3006_s9, %s1650_s27 }
 0x3ca   : > { %s1465_s24 = sshll.u32 %s1241_s12, 7  ;;  %p2000_p3 = pnand %p1999_p4, %p3010_p10 }
 0x3cb   : > { %s2854_s5 = scalar_lea.hbm %s3009_s8, %s1465_s24  ;;  %p2007_p1 = por %p2006_p0, %p2005_p7 }
 0x3cc   : > { %p2001_p5 = pneg %p2000_p3 }
 0x3ce   : > { %p2008_p11 = pnand %p2007_p1, %p2001_p5 }
 0x3d0   : > { %2011 = shalt.err (!%p2008_p11)
}
 0x3d1   : > { %s2012_s18 = scalar_lea.hbm %s2854_s5, 2048  ;;  %s2016_s27 = scalar_lea.hbm %s3009_s8, 12288 }
 0x3d2   : > { %p2013_p9 = scmp.ne.s32.totalorder %s2854_s5, %s2012_s18  ;;  %p2017_p12 = scmp.lt.u32.totalorder %s2854_s5, %s3009_s8 }
 0x3d3   : > { %p2018_p6 = scmp.lt.u32.totalorder %s2016_s27, %s2012_s18  ;;  %p2020_p4 = scmp.lt.u32.totalorder %s2012_s18, %s2854_s5 }
 0x3d4   : > { %p2014_p2 = pnand %p2013_p9, %p3010_p10 }
 0x3d5   : > { %p2019_p8 = por %p2018_p6, %p2017_p12 }
 0x3d6   : > { %p2015_p13 = pneg %p2014_p2 }
 0x3d7   : > { %p2021_p3 = por %p2020_p4, %p2019_p8 }
 0x3d9   : > { %p2022_p5 = pnand %p2021_p3, %p2015_p13 }
 0x3db   : > { %2025 = shalt.err (!%p2022_p5)
}
 0x3dc   : > { %s2167_s7 = smov 128   ;;  %s2168_s10 = smov 384  }
 0x3dd   : > { %s2169_s14 = smov 8  }
 0x3de   : > { %1663 = dma.vmem_to_hbm [thread:$0]  (%p3010_p10), %s2849_s11, 2048, %s2854_s5, %s2858_s0, %s2167_s7, %s2168_s10, %s2169_s14  }
 0x3df PF: > { %s3011_s15 = sld [smem:[#allocation17_spill]]  ;;  %s3012_s19 = sld [smem:[#allocation24_spill]] }
 0x3e0   : > { %p1688_p7 = scmp.ge.s32.totalorder %s2156_s6, 2 }
 0x3e5   : > { %s1259_s21 = sand.u32 1, %s3011_s15   ;;  %p3013_p0 = scmp.ne.s32.totalorder %s3012_s19, 0 }
 0x3e6   : > { %s1260_s18 = scalar_lea.sflag [#allocation5], %s1259_s21 }
 0x3e7   : > { %p1680_p1 = pnand %p1688_p7, %p3013_p0 }
 0x3e9   : > { %2099 = dma.done.wait (!%p1680_p1), %s1260_s18, 2048  }
 0x3ea   : > { %2101 = vsyncadd (!%p1680_p1), %s1260_s18, 4294965248  ;;  %s25_s6 = sadd.s32 1, %s2156_s6   ;;  %s3015_s18 = sld [smem:[#allocation18_spill]] }
 0x3eb   : > { %p2887_p11 = scmp.ge.s32.totalorder %s25_s6, 8   ;;  %s3016_s13 = smov %s3030_s28 }
 0x3ec   : > { %s3017_s19 = smov %s2112_s20  ;;  %s3018_s20 = smov %s2396_s2 }
 0x3ed   : > { %s3019_s21 = smov %s2120_s22  ;;  %s3020_s22 = smov %s2124_s23 }
 0x3ee   : > { %s3021_s23 = smov %s2461_s4  ;;  %s3022_s24 = smov %s2132_s25 }
 0x3ef   : > { %s3023_s25 = smov %s2136_s26  ;;  %s3024_s26 = smov %s2399_s3 }
 0x3f0   : > { %s3025_s27 = smov %s2148_s29  ;;  %s3026_s28 = smov %s2152_s30 }
 0x3f1   : > { %s3027_s29 = smov %s3016_s13  ;;  %s3028_s30 = smov %s3034_s17 }
 0x3f2   :  { %24 = sbr.rel (!%p2887_p11) target bundleno = 19 (0x13), region = 121 }
 0x3f9   :  { %1265 = vsyncpa [#allocation4], 1 }
 0x3fa   :  { %1267 = vsyncpa [#allocation4 + $0x1], 1 }
 0x3fb   :  { %1268 = vsyncpa [#allocation7], 1 }
 0x3fc   :  { %1270 = vsyncpa [#allocation7 + $0x1], 1 }
 0x3fd   :  { %1271 = vsyncpa [#allocation10], 1 }
 0x3fe   :  { %1272 = vsyncpa [#allocation5], 1 }
 0x3ff   :  { %1274 = vsyncpa [#allocation5 + $0x1], 1 }

</bundles_post_ra>
